<compile_context>
chip_gen: v6e
topology: v6e:2x2x1
jax: 0.10.0
libtpu: 0.0.40
codegen_flags: <defaults>
</compile_context>

<pallas_src>
import jax
import jax.numpy as jnp
from jax.experimental import pallas as pl
from jax.experimental.pallas import tpu as pltpu

BN_EPS = 1e-5  # config.bn_eps


def _bilinear_matrix(n_in, n_out):
    """Row-interpolation matrix for 1-D bilinear resize, align_corners=True."""
    i = jnp.arange(n_out, dtype=jnp.float32)
    if n_out == 1:
        src = jnp.zeros((1,), jnp.float32)
    else:
        src = i * (n_in - 1) / (n_out - 1)
    i0 = jnp.clip(jnp.floor(src).astype(jnp.int32), 0, n_in - 1)
    i1 = jnp.clip(i0 + 1, 0, n_in - 1)
    frac = src - i0.astype(jnp.float32)
    m = jnp.zeros((n_out, n_in), jnp.float32)
    rows = jnp.arange(n_out)
    m = m.at[rows, i0].add(1.0 - frac)
    m = m.at[rows, i1].add(frac)
    return m


def _seg_head_kernel(pT_ref, w7_ref, bnb_ref, w1T_ref, b1_ref, rh_ref, rwT_ref,
                     out_ref):
    # pT_ref : (K*K*Cin, H*W)   channel-major im2col patches, one batch element
    # w7_ref : (Cmid, K*K*Cin)  7x7 conv weights with BN scale pre-folded
    # bnb_ref: (Cmid, 1)        folded BatchNorm bias
    # w1T_ref: (Cout, Cmid)     1x1 conv weights, transposed
    # b1_ref : (Cout, 1)        1x1 conv bias
    # rh_ref : (Ho, H)          bilinear H-upsample matrix (align_corners=True)
    # rwT_ref: (W, Wo)          bilinear W-upsample matrix, transposed
    # out_ref: (Cout, Ho, Wo)   NCHW output for this batch element
    Cout = w1T_ref.shape[0]
    Ho, H = rh_ref.shape
    W, Wo = rwT_ref.shape

    # --- 7x7 conv (+ folded BN scale) as ONE im2col MXU matmul --------------
    yT = jnp.dot(w7_ref[...], pT_ref[...],
                 preferred_element_type=jnp.float32)              # (Cmid, H*W)
    # --- folded BatchNorm bias + ReLU ----------------------------------------
    yT = jnp.maximum(yT + bnb_ref[...], 0.0)

    # --- 1x1 conv (segmentation logits), channel-major ----------------------
    segT = (jnp.dot(w1T_ref[...], yT, preferred_element_type=jnp.float32)
            + b1_ref[...])                                         # (Cout, H*W)

    # --- separable bilinear upsample (align_corners=True) -------------------
    # per channel:  rh @ plane @ rw^T  ->  (Ho, Wo), stored straight into NCHW
    seg3 = segT.reshape(Cout, H, W)
    for c in range(Cout):                       # Cout is small & static
        t = jnp.dot(rh_ref[...], seg3[c],
                    preferred_element_type=jnp.float32)            # (Ho, W)
        out_ref[c] = jnp.dot(t, rwT_ref[...],
                             preferred_element_type=jnp.float32)   # (Ho, Wo)


def deeperlab_seg_head_forward(x_nchw, w7, gamma, beta, mean, var, w1, b1,
                               scale=4):
    B, Cin, H, W = x_nchw.shape
    K = w7.shape[0]
    pad = (K - 1) // 2
    Cmid = w7.shape[3]
    Cout = w1.shape[1]
    Ho, Wo = H * scale, W * scale
    KKC = K * K * Cin
    HW = H * W

    # ---- wrapper glue (plain JAX): im2col + parameter folding ---------------
    x = x_nchw.astype(jnp.float32)
    xp = jnp.pad(x, ((0, 0), (0, 0), (pad, pad), (pad, pad)))   # (B,Cin,Hp,Wp)
    # channel-major im2col: patchesT[b, (kh*K+kw)*Cin+ci, h*W+w] = xp[b,ci,h+kh,w+kw]
    slabs = [xp[:, :, kh:kh + H, kw:kw + W]
             for kh in range(K) for kw in range(K)]             # (B,Cin,H,W) each
    patchesT = jnp.stack(slabs, axis=1).reshape(B, KKC, HW)

    bn_scale = (gamma / jnp.sqrt(var + BN_EPS)).astype(jnp.float32)
    bnb = (beta - mean * bn_scale).reshape(Cmid, 1).astype(jnp.float32)
    # fold BN scale into the 7x7 weights; row ordering matches patchesT
    w7mT = jnp.transpose(w7.astype(jnp.float32) * bn_scale[None, None, None, :],
                         (3, 0, 1, 2)).reshape(Cmid, KKC)
    w1T = jnp.transpose(w1.astype(jnp.float32))                 # (Cout, Cmid)
    b1c = b1.reshape(Cout, 1).astype(jnp.float32)

    rh = _bilinear_matrix(H, Ho)                                # (Ho, H)
    rwT = jnp.transpose(_bilinear_matrix(W, Wo))                # (W, Wo)

    flops = 2 * B * (Cmid * KKC * HW + Cout * Cmid * HW
                     + Cout * (Ho * H * W + Ho * W * Wo))
    bytes_accessed = 4 * (patchesT.size + w7mT.size + bnb.size + w1T.size
                          + b1c.size + rh.size + rwT.size + B * Cout * Ho * Wo)

    out = pl.pallas_call(
        _seg_head_kernel,
        out_shape=jax.ShapeDtypeStruct((B, Cout, Ho, Wo), jnp.float32),
        grid=(B,),
        in_specs=[
            pl.BlockSpec((None, KKC, HW), lambda b: (b, 0, 0)),
            pl.BlockSpec((Cmid, KKC), lambda b: (0, 0)),
            pl.BlockSpec((Cmid, 1), lambda b: (0, 0)),
            pl.BlockSpec((Cout, Cmid), lambda b: (0, 0)),
            pl.BlockSpec((Cout, 1), lambda b: (0, 0)),
            pl.BlockSpec((Ho, H), lambda b: (0, 0)),
            pl.BlockSpec((W, Wo), lambda b: (0, 0)),
        ],
        out_specs=pl.BlockSpec((None, Cout, Ho, Wo), lambda b: (b, 0, 0, 0)),
        compiler_params=pltpu.CompilerParams(
            dimension_semantics=("parallel",)),
        cost_estimate=pl.CostEstimate(flops=flops, transcendentals=0,
                                      bytes_accessed=bytes_accessed),
    )(patchesT, w7mT, bnb, w1T, b1c, rh, rwT)
    # Output is already NCHW (B, Cout, Ho, Wo) -- no wrapper transpose needed.
    return out


if __name__ == "__main__":
    key = jax.random.PRNGKey(0)
    ks = jax.random.split(key, 8)

    B, Cin, H, W = 2, 4, 16, 16     # inplane = 4
    Cmid, Cout, scale = 256, 5, 4   # outplane = 5

    x = jax.random.normal(ks[0], (B, Cin, H, W), jnp.float32)
    w7 = jax.random.normal(ks[1], (7, 7, Cin, Cmid), jnp.float32) * 0.05
    gamma = jax.random.uniform(ks[2], (Cmid,), jnp.float32, minval=0.5, maxval=1.5)
    beta = jax.random.normal(ks[3], (Cmid,), jnp.float32) * 0.1
    mean = jax.random.normal(ks[4], (Cmid,), jnp.float32) * 0.1
    var = jax.random.uniform(ks[5], (Cmid,), jnp.float32, minval=0.5, maxval=1.5)
    w1 = jax.random.normal(ks[6], (Cmid, Cout), jnp.float32) * 0.05
    b1 = jax.random.normal(ks[7], (Cout,), jnp.float32) * 0.1

    out = deeperlab_seg_head_forward(x, w7, gamma, beta, mean, var, w1, b1, scale)
    out = jax.block_until_ready(out)
    assert out.shape == (B, Cout, H * scale, W * scale)

    # Pure-JAX reference (NHWC conv -> BN -> ReLU -> 1x1 -> bilinear, f32)
    x_nhwc = jnp.transpose(x, (0, 2, 3, 1))
    y = jax.lax.conv_general_dilated(
        x_nhwc, w7, window_strides=(1, 1), padding=[(3, 3), (3, 3)],
        dimension_numbers=('NHWC', 'HWIO', 'NHWC'),
        precision=jax.lax.Precision.HIGHEST)
    s = gamma / jnp.sqrt(var + BN_EPS)
    y = jnp.maximum(y * s + (beta - mean * s), 0.0)
    seg = jnp.einsum('nhwc,cf->nhwf', y, w1,
                     precision=jax.lax.Precision.HIGHEST) + b1
    rh = _bilinear_matrix(H, H * scale)
    rw = _bilinear_matrix(W, W * scale)
    ref = jnp.einsum('oh,pw,nhwc->nocp', rh, rw, seg,
                     precision=jax.lax.Precision.HIGHEST)
    ref = jnp.transpose(ref, (0, 2, 1, 3))  # (B, Cout, Ho, Wo)

    assert bool(jnp.allclose(out, ref, atol=1e-3, rtol=1e-3)), "mismatch vs reference"
    print("KERNEL_OK")
</pallas_src>

<mosaic_0001>
module attributes {stable_mosaic.version = 11 : i64} {
  func.func @_seg_head_kernel(%arg0: i32, %arg1: memref<1x196x256xf32, #tpu.memory_space<vmem>>, %arg2: memref<256x196xf32, #tpu.memory_space<vmem>>, %arg3: memref<256x1xf32, #tpu.memory_space<vmem>>, %arg4: memref<5x256xf32, #tpu.memory_space<vmem>>, %arg5: memref<5x1xf32, #tpu.memory_space<vmem>>, %arg6: memref<64x16xf32, #tpu.memory_space<vmem>>, %arg7: memref<16x64xf32, #tpu.memory_space<vmem>>, %arg8: memref<1x5x64x64xf32, #tpu.memory_space<vmem>>) attributes {dimension_semantics = [#tpu.dimension_semantics<parallel>], iteration_bounds = array<i64: 2>, scalar_prefetch = 0 : i64, scratch_operands = 0 : i64, tpu.core_type = #tpu.core_type<tc>, window_params = [{transform_indices = @transform_0, window_bounds = array<i64: 1, 196, 256>}, {pipeline_mode = #tpu.pipeline_mode<synchronous>, transform_indices = @transform_1, window_bounds = array<i64: 256, 196>}, {pipeline_mode = #tpu.pipeline_mode<synchronous>, transform_indices = @transform_2, window_bounds = array<i64: 256, 1>}, {pipeline_mode = #tpu.pipeline_mode<synchronous>, transform_indices = @transform_3, window_bounds = array<i64: 5, 256>}, {pipeline_mode = #tpu.pipeline_mode<synchronous>, transform_indices = @transform_4, window_bounds = array<i64: 5, 1>}, {pipeline_mode = #tpu.pipeline_mode<synchronous>, transform_indices = @transform_5, window_bounds = array<i64: 64, 16>}, {pipeline_mode = #tpu.pipeline_mode<synchronous>, transform_indices = @transform_6, window_bounds = array<i64: 16, 64>}, {transform_indices = @transform_7, window_bounds = array<i64: 1, 5, 64, 64>}]} {
    %c0 = arith.constant 0 : index
    %c0_0 = arith.constant 0 : index
    %0 = vector.load %arg2[%c0, %c0_0] : memref<256x196xf32, #tpu.memory_space<vmem>>, vector<256x196xf32>
    %c0_1 = arith.constant 0 : index
    %c0_2 = arith.constant 0 : index
    %c0_3 = arith.constant 0 : index
    %1 = vector.load %arg1[%c0_1, %c0_2, %c0_3] : memref<1x196x256xf32, #tpu.memory_space<vmem>>, vector<1x196x256xf32>
    %2 = vector.shape_cast %1 : vector<1x196x256xf32> to vector<196x256xf32>
    %cst = arith.constant dense<0.000000e+00> : vector<256x256xf32>
    %3 = tpu.matmul %0, %2, %cst {dimension_numbers = #tpu.dot_dimension_numbers<[1], [0], [0], [1], [0, 0, 1, 1], [], []>} : vector<256x196xf32>, vector<196x256xf32>, vector<256x256xf32> -> vector<256x256xf32>
    %c0_4 = arith.constant 0 : index
    %c0_5 = arith.constant 0 : index
    %4 = vector.load %arg3[%c0_4, %c0_5] : memref<256x1xf32, #tpu.memory_space<vmem>>, vector<256x1xf32>
    %5 = vector.broadcast %4 : vector<256x1xf32> to vector<256x256xf32>
    %6 = arith.addf %3, %5 : vector<256x256xf32>
    %cst_6 = arith.constant 0.000000e+00 : f32
    %7 = vector.broadcast %cst_6 : f32 to vector<256x256xf32>
    %8 = arith.maximumf %6, %7 : vector<256x256xf32>
    %c0_7 = arith.constant 0 : index
    %c0_8 = arith.constant 0 : index
    %9 = vector.load %arg4[%c0_7, %c0_8] : memref<5x256xf32, #tpu.memory_space<vmem>>, vector<5x256xf32>
    %cst_9 = arith.constant dense<0.000000e+00> : vector<5x256xf32>
    %10 = tpu.matmul %9, %8, %cst_9 {dimension_numbers = #tpu.dot_dimension_numbers<[1], [0], [0], [1], [0, 0, 1, 1], [], []>} : vector<5x256xf32>, vector<256x256xf32>, vector<5x256xf32> -> vector<5x256xf32>
    %c0_10 = arith.constant 0 : index
    %c0_11 = arith.constant 0 : index
    %11 = vector.load %arg5[%c0_10, %c0_11] : memref<5x1xf32, #tpu.memory_space<vmem>>, vector<5x1xf32>
    %12 = vector.broadcast %11 : vector<5x1xf32> to vector<5x256xf32>
    %13 = arith.addf %10, %12 : vector<5x256xf32>
    %14 = vector.shape_cast %13 : vector<5x256xf32> to vector<5x16x16xf32>
    %c0_12 = arith.constant 0 : index
    %c0_13 = arith.constant 0 : index
    %15 = vector.load %arg6[%c0_12, %c0_13] : memref<64x16xf32, #tpu.memory_space<vmem>>, vector<64x16xf32>
    %16 = vector.extract_strided_slice %14 {offsets = [0, 0, 0], sizes = [1, 16, 16], strides = [1, 1, 1]} : vector<5x16x16xf32> to vector<1x16x16xf32>
    %17 = vector.shape_cast %16 : vector<1x16x16xf32> to vector<16x16xf32>
    %cst_14 = arith.constant dense<0.000000e+00> : vector<64x16xf32>
    %18 = tpu.matmul %15, %17, %cst_14 {dimension_numbers = #tpu.dot_dimension_numbers<[1], [0], [0], [1], [0, 0, 1, 1], [], []>} : vector<64x16xf32>, vector<16x16xf32>, vector<64x16xf32> -> vector<64x16xf32>
    %c0_15 = arith.constant 0 : index
    %c0_16 = arith.constant 0 : index
    %19 = vector.load %arg7[%c0_15, %c0_16] : memref<16x64xf32, #tpu.memory_space<vmem>>, vector<16x64xf32>
    %cst_17 = arith.constant dense<0.000000e+00> : vector<64x64xf32>
    %20 = tpu.matmul %18, %19, %cst_17 {dimension_numbers = #tpu.dot_dimension_numbers<[1], [0], [0], [1], [0, 0, 1, 1], [], []>} : vector<64x16xf32>, vector<16x64xf32>, vector<64x64xf32> -> vector<64x64xf32>
    %c0_18 = arith.constant 0 : index
    %c0_19 = arith.constant 0 : index
    %c0_20 = arith.constant 0 : index
    %c0_21 = arith.constant 0 : index
    %21 = vector.load %arg8[%c0_18, %c0_19, %c0_20, %c0_21] : memref<1x5x64x64xf32, #tpu.memory_space<vmem>>, vector<1x1x64x64xf32>
    %22 = vector.shape_cast %21 : vector<1x1x64x64xf32> to vector<64x64xf32>
    %23 = vector.shape_cast %20 : vector<64x64xf32> to vector<1x1x64x64xf32>
    tpu.vector_store %arg8[%c0_18, %c0_19, %c0_20, %c0_21], %23 {strides = array<i32>} : memref<1x5x64x64xf32, #tpu.memory_space<vmem>>, vector<1x1x64x64xf32>,
    %c0_22 = arith.constant 0 : index
    %c0_23 = arith.constant 0 : index
    %24 = vector.load %arg6[%c0_22, %c0_23] : memref<64x16xf32, #tpu.memory_space<vmem>>, vector<64x16xf32>
    %25 = vector.extract_strided_slice %14 {offsets = [1, 0, 0], sizes = [1, 16, 16], strides = [1, 1, 1]} : vector<5x16x16xf32> to vector<1x16x16xf32>
    %26 = vector.shape_cast %25 : vector<1x16x16xf32> to vector<16x16xf32>
    %cst_24 = arith.constant dense<0.000000e+00> : vector<64x16xf32>
    %27 = tpu.matmul %24, %26, %cst_24 {dimension_numbers = #tpu.dot_dimension_numbers<[1], [0], [0], [1], [0, 0, 1, 1], [], []>} : vector<64x16xf32>, vector<16x16xf32>, vector<64x16xf32> -> vector<64x16xf32>
    %c0_25 = arith.constant 0 : index
    %c0_26 = arith.constant 0 : index
    %28 = vector.load %arg7[%c0_25, %c0_26] : memref<16x64xf32, #tpu.memory_space<vmem>>, vector<16x64xf32>
    %cst_27 = arith.constant dense<0.000000e+00> : vector<64x64xf32>
    %29 = tpu.matmul %27, %28, %cst_27 {dimension_numbers = #tpu.dot_dimension_numbers<[1], [0], [0], [1], [0, 0, 1, 1], [], []>} : vector<64x16xf32>, vector<16x64xf32>, vector<64x64xf32> -> vector<64x64xf32>
    %c0_28 = arith.constant 0 : index
    %c1 = arith.constant 1 : index
    %c0_29 = arith.constant 0 : index
    %c0_30 = arith.constant 0 : index
    %30 = vector.load %arg8[%c0_28, %c1, %c0_29, %c0_30] : memref<1x5x64x64xf32, #tpu.memory_space<vmem>>, vector<1x1x64x64xf32>
    %31 = vector.shape_cast %30 : vector<1x1x64x64xf32> to vector<64x64xf32>
    %32 = vector.shape_cast %29 : vector<64x64xf32> to vector<1x1x64x64xf32>
    tpu.vector_store %arg8[%c0_28, %c1, %c0_29, %c0_30], %32 {strides = array<i32>} : memref<1x5x64x64xf32, #tpu.memory_space<vmem>>, vector<1x1x64x64xf32>,
    %c0_31 = arith.constant 0 : index
    %c0_32 = arith.constant 0 : index
    %33 = vector.load %arg6[%c0_31, %c0_32] : memref<64x16xf32, #tpu.memory_space<vmem>>, vector<64x16xf32>
    %34 = vector.extract_strided_slice %14 {offsets = [2, 0, 0], sizes = [1, 16, 16], strides = [1, 1, 1]} : vector<5x16x16xf32> to vector<1x16x16xf32>
    %35 = vector.shape_cast %34 : vector<1x16x16xf32> to vector<16x16xf32>
    %cst_33 = arith.constant dense<0.000000e+00> : vector<64x16xf32>
    %36 = tpu.matmul %33, %35, %cst_33 {dimension_numbers = #tpu.dot_dimension_numbers<[1], [0], [0], [1], [0, 0, 1, 1], [], []>} : vector<64x16xf32>, vector<16x16xf32>, vector<64x16xf32> -> vector<64x16xf32>
    %c0_34 = arith.constant 0 : index
    %c0_35 = arith.constant 0 : index
    %37 = vector.load %arg7[%c0_34, %c0_35] : memref<16x64xf32, #tpu.memory_space<vmem>>, vector<16x64xf32>
    %cst_36 = arith.constant dense<0.000000e+00> : vector<64x64xf32>
    %38 = tpu.matmul %36, %37, %cst_36 {dimension_numbers = #tpu.dot_dimension_numbers<[1], [0], [0], [1], [0, 0, 1, 1], [], []>} : vector<64x16xf32>, vector<16x64xf32>, vector<64x64xf32> -> vector<64x64xf32>
    %c0_37 = arith.constant 0 : index
    %c2 = arith.constant 2 : index
    %c0_38 = arith.constant 0 : index
    %c0_39 = arith.constant 0 : index
    %39 = vector.load %arg8[%c0_37, %c2, %c0_38, %c0_39] : memref<1x5x64x64xf32, #tpu.memory_space<vmem>>, vector<1x1x64x64xf32>
    %40 = vector.shape_cast %39 : vector<1x1x64x64xf32> to vector<64x64xf32>
    %41 = vector.shape_cast %38 : vector<64x64xf32> to vector<1x1x64x64xf32>
    tpu.vector_store %arg8[%c0_37, %c2, %c0_38, %c0_39], %41 {strides = array<i32>} : memref<1x5x64x64xf32, #tpu.memory_space<vmem>>, vector<1x1x64x64xf32>,
    %c0_40 = arith.constant 0 : index
    %c0_41 = arith.constant 0 : index
    %42 = vector.load %arg6[%c0_40, %c0_41] : memref<64x16xf32, #tpu.memory_space<vmem>>, vector<64x16xf32>
    %43 = vector.extract_strided_slice %14 {offsets = [3, 0, 0], sizes = [1, 16, 16], strides = [1, 1, 1]} : vector<5x16x16xf32> to vector<1x16x16xf32>
    %44 = vector.shape_cast %43 : vector<1x16x16xf32> to vector<16x16xf32>
    %cst_42 = arith.constant dense<0.000000e+00> : vector<64x16xf32>
    %45 = tpu.matmul %42, %44, %cst_42 {dimension_numbers = #tpu.dot_dimension_numbers<[1], [0], [0], [1], [0, 0, 1, 1], [], []>} : vector<64x16xf32>, vector<16x16xf32>, vector<64x16xf32> -> vector<64x16xf32>
    %c0_43 = arith.constant 0 : index
    %c0_44 = arith.constant 0 : index
    %46 = vector.load %arg7[%c0_43, %c0_44] : memref<16x64xf32, #tpu.memory_space<vmem>>, vector<16x64xf32>
    %cst_45 = arith.constant dense<0.000000e+00> : vector<64x64xf32>
    %47 = tpu.matmul %45, %46, %cst_45 {dimension_numbers = #tpu.dot_dimension_numbers<[1], [0], [0], [1], [0, 0, 1, 1], [], []>} : vector<64x16xf32>, vector<16x64xf32>, vector<64x64xf32> -> vector<64x64xf32>
    %c0_46 = arith.constant 0 : index
    %c3 = arith.constant 3 : index
    %c0_47 = arith.constant 0 : index
    %c0_48 = arith.constant 0 : index
    %48 = vector.load %arg8[%c0_46, %c3, %c0_47, %c0_48] : memref<1x5x64x64xf32, #tpu.memory_space<vmem>>, vector<1x1x64x64xf32>
    %49 = vector.shape_cast %48 : vector<1x1x64x64xf32> to vector<64x64xf32>
    %50 = vector.shape_cast %47 : vector<64x64xf32> to vector<1x1x64x64xf32>
    tpu.vector_store %arg8[%c0_46, %c3, %c0_47, %c0_48], %50 {strides = array<i32>} : memref<1x5x64x64xf32, #tpu.memory_space<vmem>>, vector<1x1x64x64xf32>,
    %c0_49 = arith.constant 0 : index
    %c0_50 = arith.constant 0 : index
    %51 = vector.load %arg6[%c0_49, %c0_50] : memref<64x16xf32, #tpu.memory_space<vmem>>, vector<64x16xf32>
    %52 = vector.extract_strided_slice %14 {offsets = [4, 0, 0], sizes = [1, 16, 16], strides = [1, 1, 1]} : vector<5x16x16xf32> to vector<1x16x16xf32>
    %53 = vector.shape_cast %52 : vector<1x16x16xf32> to vector<16x16xf32>
    %cst_51 = arith.constant dense<0.000000e+00> : vector<64x16xf32>
    %54 = tpu.matmul %51, %53, %cst_51 {dimension_numbers = #tpu.dot_dimension_numbers<[1], [0], [0], [1], [0, 0, 1, 1], [], []>} : vector<64x16xf32>, vector<16x16xf32>, vector<64x16xf32> -> vector<64x16xf32>
    %c0_52 = arith.constant 0 : index
    %c0_53 = arith.constant 0 : index
    %55 = vector.load %arg7[%c0_52, %c0_53] : memref<16x64xf32, #tpu.memory_space<vmem>>, vector<16x64xf32>
    %cst_54 = arith.constant dense<0.000000e+00> : vector<64x64xf32>
    %56 = tpu.matmul %54, %55, %cst_54 {dimension_numbers = #tpu.dot_dimension_numbers<[1], [0], [0], [1], [0, 0, 1, 1], [], []>} : vector<64x16xf32>, vector<16x64xf32>, vector<64x64xf32> -> vector<64x64xf32>
    %c0_55 = arith.constant 0 : index
    %c4 = arith.constant 4 : index
    %c0_56 = arith.constant 0 : index
    %c0_57 = arith.constant 0 : index
    %57 = vector.load %arg8[%c0_55, %c4, %c0_56, %c0_57] : memref<1x5x64x64xf32, #tpu.memory_space<vmem>>, vector<1x1x64x64xf32>
    %58 = vector.shape_cast %57 : vector<1x1x64x64xf32> to vector<64x64xf32>
    %59 = vector.shape_cast %56 : vector<64x64xf32> to vector<1x1x64x64xf32>
    tpu.vector_store %arg8[%c0_55, %c4, %c0_56, %c0_57], %59 {strides = array<i32>} : memref<1x5x64x64xf32, #tpu.memory_space<vmem>>, vector<1x1x64x64xf32>,
    return
  }
  func.func @transform_0(%arg0: i32) -> (i32, i32, i32) {
    %c0_i32 = arith.constant 0 : i32
    %c0_i32_0 = arith.constant 0 : i32
    %c0_i32_1 = arith.constant 0 : i32
    return %arg0, %c0_i32, %c0_i32_0 : i32, i32, i32
  }
  func.func @transform_1(%arg0: i32) -> (i32, i32) {
    %c0_i32 = arith.constant 0 : i32
    %c0_i32_0 = arith.constant 0 : i32
    %c0_i32_1 = arith.constant 0 : i32
    return %c0_i32, %c0_i32_0 : i32, i32
  }
  func.func @transform_2(%arg0: i32) -> (i32, i32) {
    %c0_i32 = arith.constant 0 : i32
    %c0_i32_0 = arith.constant 0 : i32
    %c0_i32_1 = arith.constant 0 : i32
    return %c0_i32, %c0_i32_0 : i32, i32
  }
  func.func @transform_3(%arg0: i32) -> (i32, i32) {
    %c0_i32 = arith.constant 0 : i32
    %c0_i32_0 = arith.constant 0 : i32
    %c0_i32_1 = arith.constant 0 : i32
    return %c0_i32, %c0_i32_0 : i32, i32
  }
  func.func @transform_4(%arg0: i32) -> (i32, i32) {
    %c0_i32 = arith.constant 0 : i32
    %c0_i32_0 = arith.constant 0 : i32
    %c0_i32_1 = arith.constant 0 : i32
    return %c0_i32, %c0_i32_0 : i32, i32
  }
  func.func @transform_5(%arg0: i32) -> (i32, i32) {
    %c0_i32 = arith.constant 0 : i32
    %c0_i32_0 = arith.constant 0 : i32
    %c0_i32_1 = arith.constant 0 : i32
    return %c0_i32, %c0_i32_0 : i32, i32
  }
  func.func @transform_6(%arg0: i32) -> (i32, i32) {
    %c0_i32 = arith.constant 0 : i32
    %c0_i32_0 = arith.constant 0 : i32
    %c0_i32_1 = arith.constant 0 : i32
    return %c0_i32, %c0_i32_0 : i32, i32
  }
  func.func @transform_7(%arg0: i32) -> (i32, i32, i32, i32) {
    %c0_i32 = arith.constant 0 : i32
    %c0_i32_0 = arith.constant 0 : i32
    %c0_i32_1 = arith.constant 0 : i32
    %c0_i32_2 = arith.constant 0 : i32
    return %arg0, %c0_i32, %c0_i32_0, %c0_i32_1 : i32, i32, i32, i32
  }
}

</mosaic_0001>

<bundles_post_ra>
// kernel: tpu_custom_call.1
= control target key start
LH: loop header
LB: loop body
LE: loop exit
PB: predicated region body
PF: predicated region fallthrough
CT: control target
= control target key end

     0   :  { %12 = vsyncpa [#allocation3], 0  ;;  %s4356_s0 = inlined_call_operand.vmem [shape: f32[2,196,256], index: 0, kind: input, shape index: {}]   ;;  %s4357_s1 = inlined_call_operand.vmem [shape: f32[256,196], index: 1, kind: input, shape index: {}]   ;;  %s4358_s2 = inlined_call_operand.vmem [shape: f32[256,1], index: 2, kind: input, shape index: {}]   ;;  %s4359_s3 = inlined_call_operand.vmem [shape: f32[5,256], index: 3, kind: input, shape index: {}]   ;;  %s4360_s4 = inlined_call_operand.vmem [shape: f32[5,1], index: 4, kind: input, shape index: {}]   ;;  %s4361_s5 = inlined_call_operand.vmem [shape: f32[64,16], index: 5, kind: input, shape index: {}]   ;;  %s4362_s6 = inlined_call_operand.vmem [shape: f32[16,64], index: 6, kind: input, shape index: {}]   ;;  %s4363_s7 = inlined_call_operand.hbm [shape: f32[2,5,64,64], index: 7, kind: output, shape index: {}]  }
   0x1   :  { %14 = vsyncpa [#allocation3 + $0x1], 0  ;;  %s3416_s24 = smov 0   ;;  %s3418_s25 = smov 0  }
   0x2   :  { %s3420_s26 = smov 0   ;;  %s3422_s27 = smov 0  }
   0x3 LB: > { %s3437_s28 = sadd.s32 4294967295, %s3361_s27   ;;  %s2827_s29 = sadd.s32 4294967294, %s3361_s27   ;;  %s3361_s27 = sphi %s3422_s27, %s4369_s27   ;;  %s3357_s26 = sphi %s3420_s26, %s4368_s26   ;;  %s3353_s25 = sphi %s3418_s25, %s4367_s25   ;;  %s3349_s24 = sphi %s3416_s24, %s4366_s24  }
   0x4   : > { %s3441_s30 = sadd.s32 1, %s3361_s27   ;;  %s179_s8 = sadd.s32 1, %s3357_s26 }
   0x5   : > { %s176_s9 = ssub.s32 %s3361_s27, %s3441_s30  ;;  %p189_p0 = scmp.ne.s32.totalorder %s3357_s26, %s3353_s25 }
   0x6   : > { %p177_p1 = scmp.eq.s32.totalorder %s176_s9, 0  ;;  %p190_p2 = scmp.eq.s32.totalorder %s3437_s28, 1 }
   0x7   : > { %p195_p3 = scmp.ne.s32.totalorder %s3353_s25, %s3349_s24  ;;  %p196_p4 = scmp.eq.s32.totalorder %s2827_s29, 1 }
   0x8   : > { %s3452_s10 = scalar_select %p177_p1, %s3357_s26, %s179_s8  }
   0x9   : > { %p3454_p5 = por %p190_p2, %p189_p0  ;;  %p3458_p6 = por %p196_p4, %p195_p3 }
   0xa   : > { %p2830_p7 = scmp.ge.s32.totalorder %s3361_s27, 1  ;;  %p240_p8 = scmp.lt.s32.totalorder %s3361_s27, 3 }
   0xc   : > { %p241_p9 = pnand %p2830_p7, %p240_p8 }
   0xd   : > { %p272_p10 = scmp.lt.s32.totalorder (!%p241_p9), %s3437_s28, 1  ;;  %s3364_s22 = smov (!%p241_p9), 96  }
   0xe   : > { %244 = sbr.rel (%p241_p9) target bundleno = 2042 (0x7fa), region = 48  ;;  %s3365_s23 = smov (!%p241_p9), 112  }
   0xf   : > { %s3366_s29 = smov (!%p241_p9), 64   ;;  %s3367_s8 = smov (!%p241_p9), 80  }
  0x10   : > { %s3368_s9 = smov (!%p241_p9), 48   ;;  %s3369_s13 = smov (!%p241_p9), 16  }
  0x11   : > { %s3370_s14 = smov (!%p241_p9), 32   ;;  %s269_s21 = sand.u32 (!%p241_p9), 1, %s3353_s25  }
  0x13   : > { %v278_v0 = vld [vmem:[%s4357_s1 + $0x8] sm:$0xff]  ;;  %vm583_vm0 = vcmask 556032   ;;  %s273_s15 = scalar_select %p272_p10, %s3437_s28, 1  ;;  %v3363_v1 = vmov 0   ;;  %v406_v24 = vld [vmem:[%s4358_s2 + $0x78] sm:$0xff]  ;;  %v403_v26 = vld [vmem:[%s4358_s2 + $0x60] sm:$0xff] }
  0x14   : > { %2834 = vmatprep.mubr.msk.f32.mxu0 %vm583_vm0, %v278_v0  ;;  %3300 = vset.pattern.permute.xlu1 %v3363_v1  ;;  %v404_v22 = vld [vmem:[%s4358_s2 + $0x68] sm:$0xff]  ;;  %v405_v28 = vld [vmem:[%s4358_s2 + $0x70] sm:$0xff]  ;;  %v402_v34 = vld [vmem:[%s4358_s2 + $0x58] sm:$0xff]  ;;  %vm680_vm1 = vcmask 1043456   ;;  %vm1373_vm2 = vcmask 130048   ;;  %vm1634_vm3 = vcmask 523264  }
  0x15   : > { %3299 = vset.pattern.permute.xlu0 %v3363_v1  ;;  %s3246_s16 = smul.u32 400, %s273_s15  ;;  %490 = vperm.xlu1 %3300, %v404_v22   ;;  %v401_v32 = vld [vmem:[%s4358_s2 + $0x50] sm:$0xff]  ;;  %v399_v38 = vld [vmem:[%s4358_s2 + $0x40] sm:$0xff]  ;;  %v400_v40 = vld [vmem:[%s4358_s2 + $0x48] sm:$0xff] }
  0x16   : > { %500 = vperm.xlu0 %3299, %v406_v24   ;;  %v397_v44 = vld [vmem:[%s4358_s2 + $0x30] sm:$0xff]  ;;  %v398_v46 = vld [vmem:[%s4358_s2 + $0x38] sm:$0xff]  ;;  %v395_v50 = vld [vmem:[%s4358_s2 + $0x20] sm:$0xff] }
  0x17   : > { %s3473_s19 = scalar_lea.vmem %s4356_s0, %s3246_s16  ;;  %v396_v52 = vld [vmem:[%s4358_s2 + $0x28] sm:$0xff]  ;;  %v393_v56 = vld [vmem:[%s4358_s2 + $0x10] sm:$0xff]  ;;  %v394_v58 = vld [vmem:[%s4358_s2 + $0x18] sm:$0xff]  ;;  %s3373_s16 = smov [#allocation2]  }
  0x18   : > { %v372_v2 = vld [vmem:[%s3473_s19 + $0xf8] sm:$0xff]  ;;  %v371_v3 = vld [vmem:[%s3473_s19 + $0xf0] sm:$0xff]  ;;  %v370_v4 = vld [vmem:[%s3473_s19 + $0xe8] sm:$0xff]  ;;  %s3305_s17 = sshll.u32 %s3373_s16, 4  ;;  %s3306_s17 = int_to_ptr.vmem [resolvable:$false] %s3305_s17 }
  0x19   : > { %687 = vmatprep.subr.mxu0 %v372_v2  ;;  %v369_v5 = vld [vmem:[%s3473_s19 + $0xe0] sm:$0xff]  ;;  %v368_v6 = vld [vmem:[%s3473_s19 + $0xd8] sm:$0xff]  ;;  %v367_v7 = vld [vmem:[%s3473_s19 + $0xd0] sm:$0xff]  ;;  %485 = vperm.xlu1 %3300, %v403_v26   ;;  %s3307_s18 = scalar_lea.vmem %s3306_s17, 10240 }
  0x1a   : > { %688 = vmatpush1.msra.mxu0 %v371_v3  ;;  %v366_v8 = vld [vmem:[%s3473_s19 + $0xc8] sm:$0xff]  ;;  %v365_v9 = vld [vmem:[%s3473_s19 + $0xc0] sm:$0xff]  ;;  %v364_v10 = vld [vmem:[%s3473_s19 + $0xb8] sm:$0xff]  ;;  %495 = vperm.xlu0 %3299, %v405_v28  }
  0x1b   : > { %689 = vmatprep.subr.mxu0 %v370_v4  ;;  %v363_v11 = vld [vmem:[%s3473_s19 + $0xb0] sm:$0xff]  ;;  %v362_v12 = vld [vmem:[%s3473_s19 + $0xa8] sm:$0xff]  ;;  %v361_v13 = vld [vmem:[%s3473_s19 + $0xa0] sm:$0xff] }
  0x1c   : > { %690 = vmatpush1.msra.mxu0 %v369_v5  ;;  %v360_v14 = vld [vmem:[%s3473_s19 + $0x98] sm:$0xff]  ;;  %v359_v15 = vld [vmem:[%s3473_s19 + $0x90] sm:$0xff]  ;;  %v358_v16 = vld [vmem:[%s3473_s19 + $0x88] sm:$0xff] }
  0x1d   : > { %691 = vmatprep.subr.mxu0 %v368_v6  ;;  %v357_v17 = vld [vmem:[%s3473_s19 + $0x80] sm:$0xff]  ;;  %v356_v18 = vld [vmem:[%s3473_s19 + $0x78] sm:$0xff]  ;;  %v355_v19 = vld [vmem:[%s3473_s19 + $0x70] sm:$0xff]  ;;  %475 = vperm.xlu1 %3300, %v401_v32  }
  0x1e   : > { %692 = vmatpush1.msra.mxu0 %v367_v7  ;;  %v354_v20 = vld [vmem:[%s3473_s19 + $0x68] sm:$0xff]  ;;  %v353_v21 = vld [vmem:[%s3473_s19 + $0x60] sm:$0xff]  ;;  %v352_v23 = vld [vmem:[%s3473_s19 + $0x58] sm:$0xff]  ;;  %480 = vperm.xlu0 %3299, %v402_v34  }
  0x1f   : > { %693 = vmatprep.subr.mxu0 %v366_v8  ;;  %v351_v25 = vld [vmem:[%s3473_s19 + $0x50] sm:$0xff]  ;;  %v350_v27 = vld [vmem:[%s3473_s19 + $0x48] sm:$0xff]  ;;  %v349_v29 = vld [vmem:[%s3473_s19 + $0x40] sm:$0xff] }
  0x20   : > { %694 = vmatpush1.msra.mxu0 %v365_v9  ;;  %v348_v30 = vld [vmem:[%s3473_s19 + $0x38] sm:$0xff]  ;;  %v347_v31 = vld [vmem:[%s3473_s19 + $0x30] sm:$0xff]  ;;  %v346_v33 = vld [vmem:[%s3473_s19 + $0x28] sm:$0xff] }
  0x21   : > { %695 = vmatprep.subr.mxu0 %v364_v10  ;;  %v345_v35 = vld [vmem:[%s3473_s19 + $0x20] sm:$0xff]  ;;  %v344_v36 = vld [vmem:[%s3473_s19 + $0x18] sm:$0xff]  ;;  %v343_v37 = vld [vmem:[%s3473_s19 + $0x10] sm:$0xff]  ;;  %465 = vperm.xlu1 %3300, %v399_v38  }
  0x22   : > { %696 = vmatpush1.msra.mxu0 %v363_v11  ;;  %v342_v39 = vld [vmem:[%s3473_s19 + $0x8] sm:$0xff]  ;;  %v341_v41 = vld [vmem:[%s3473_s19] sm:$0xff]  ;;  %470 = vperm.xlu0 %3299, %v400_v40   ;;  %v388_v45 = vld [vmem:[%s3473_s19 + $0x178] sm:$0xff] }
  0x23   : > { %697 = vmatprep.subr.mxu0 %v362_v12  ;;  %v390_v42 = vld [vmem:[%s3473_s19 + $0x188] sm:$0xf]  ;;  %v389_v43 = vld [vmem:[%s3473_s19 + $0x180] sm:$0xf]  ;;  %v387_v47 = vld [vmem:[%s3473_s19 + $0x170] sm:$0xff] }
  0x24   : > { %698 = vmatpush1.msra.mxu0 %v361_v13  ;;  %v386_v48 = vld [vmem:[%s3473_s19 + $0x168] sm:$0xff]  ;;  %v385_v49 = vld [vmem:[%s3473_s19 + $0x160] sm:$0xff]  ;;  %v384_v51 = vld [vmem:[%s3473_s19 + $0x158] sm:$0xff] }
  0x25   : > { %699 = vmatprep.subr.mxu0 %v360_v14  ;;  %455 = vperm.xlu1 %3300, %v397_v44   ;;  %v383_v53 = vld [vmem:[%s3473_s19 + $0x150] sm:$0xff]  ;;  %v382_v54 = vld [vmem:[%s3473_s19 + $0x148] sm:$0xff]  ;;  %v381_v55 = vld [vmem:[%s3473_s19 + $0x140] sm:$0xff] }
  0x26   : > { %700 = vmatpush1.msra.mxu0 %v359_v15  ;;  %460 = vperm.xlu0 %3299, %v398_v46   ;;  %v380_v57 = vld [vmem:[%s3473_s19 + $0x138] sm:$0xff]  ;;  %v379_v59 = vld [vmem:[%s3473_s19 + $0x130] sm:$0xff]  ;;  %v378_v60 = vld [vmem:[%s3473_s19 + $0x128] sm:$0xff] }
  0x27   : > { %701 = vmatprep.subr.mxu0 %v358_v16  ;;  %v377_v61 = vld [vmem:[%s3473_s19 + $0x120] sm:$0xff]  ;;  %v376_v63 = vld [vmem:[%s3473_s19 + $0x118] sm:$0xff]  ;;  %v392_v0 = vld [vmem:[%s4358_s2 + $0x8] sm:$0xff] }
  0x28   : > { %702 = vmatpush1.msra.mxu0 %v357_v17  ;;  %v391_v62 = vld [vmem:[%s4358_s2] sm:$0xff]  ;;  %v375_v1 = vld [vmem:[%s3473_s19 + $0x110] sm:$0xff]  ;;  %v374_v2 = vld [vmem:[%s3473_s19 + $0x108] sm:$0xff] }
  0x29   : > { %703 = vmatprep.subr.mxu0 %v356_v18  ;;  %445 = vperm.xlu1 %3300, %v395_v50   ;;  %v373_v3 = vld [vmem:[%s3473_s19 + $0x100] sm:$0xff]  ;;  %v421_v4 = vld [vmem:[%s4358_s2 + $0xf0] sm:$0xff]  ;;  %v422_v6 = vld [vmem:[%s4358_s2 + $0xf8] sm:$0xff] }
  0x2a   : > { %704 = vmatpush1.msra.mxu0 %v355_v19  ;;  %450 = vperm.xlu0 %3299, %v396_v52   ;;  %v277_v5 = vld [vmem:[%s4357_s1] sm:$0xff]  ;;  %v280_v7 = vld [vmem:[%s4357_s1 + $0x18] sm:$0xff]  ;;  %v279_v9 = vld [vmem:[%s4357_s1 + $0x10] sm:$0xff] }
  0x2b   : > { %705 = vmatprep.subr.mxu0 %v354_v20  ;;  %v419_v8 = vld [vmem:[%s4358_s2 + $0xe0] sm:$0xff]  ;;  %v420_v10 = vld [vmem:[%s4358_s2 + $0xe8] sm:$0xff]  ;;  %v417_v12 = vld [vmem:[%s4358_s2 + $0xd0] sm:$0xff] }
  0x2c   : > { %706 = vmatpush1.msra.mxu0 %v353_v21  ;;  %v282_v11 = vld [vmem:[%s4357_s1 + $0x28] sm:$0xff]  ;;  %v281_v13 = vld [vmem:[%s4357_s1 + $0x20] sm:$0xff]  ;;  %v418_v14 = vld [vmem:[%s4358_s2 + $0xd8] sm:$0xff] }
  0x2d   : > { %707 = vmatprep.subr.mxu0 %v352_v23  ;;  %435 = vperm.xlu1 %3300, %v393_v56   ;;  %v284_v15 = vld [vmem:[%s4357_s1 + $0x38] sm:$0xff]  ;;  %v415_v16 = vld [vmem:[%s4358_s2 + $0xc0] sm:$0xff]  ;;  %v283_v17 = vld [vmem:[%s4357_s1 + $0x30] sm:$0xff] }
  0x2e   : > { %708 = vmatpush1.msra.mxu0 %v351_v25  ;;  %440 = vperm.xlu0 %3299, %v394_v58   ;;  %v416_v18 = vld [vmem:[%s4358_s2 + $0xc8] sm:$0xff]  ;;  %v413_v20 = vld [vmem:[%s4358_s2 + $0xb0] sm:$0xff]  ;;  %v285_v21 = vld [vmem:[%s4357_s1 + $0x40] sm:$0xff] }
  0x2f   : > { %709 = vmatprep.subr.mxu0 %v350_v27  ;;  %v286_v19 = vld [vmem:[%s4357_s1 + $0x48] sm:$0xff]  ;;  %v414_v22 = vld [vmem:[%s4358_s2 + $0xb8] sm:$0xff]  ;;  %v411_v24 = vld [vmem:[%s4358_s2 + $0xa0] sm:$0xff] }
  0x30   : > { %710 = vmatpush1.msra.mxu0 %v349_v29  ;;  %v288_v23 = vld [vmem:[%s4357_s1 + $0x58] sm:$0xff]  ;;  %v287_v25 = vld [vmem:[%s4357_s1 + $0x50] sm:$0xff]  ;;  %v412_v26 = vld [vmem:[%s4358_s2 + $0xa8] sm:$0xff] }
  0x31   : > { %711 = vmatprep.subr.mxu0 %v348_v30  ;;  %425 = vperm.xlu1 %3300, %v391_v62   ;;  %v290_v27 = vld [vmem:[%s4357_s1 + $0x68] sm:$0xff]  ;;  %v409_v28 = vld [vmem:[%s4358_s2 + $0x90] sm:$0xff]  ;;  %v289_v29 = vld [vmem:[%s4357_s1 + $0x60] sm:$0xff] }
  0x32   : > { %712 = vmatpush1.msra.mxu0 %v347_v31  ;;  %430 = vperm.xlu0 %3299, %v392_v0   ;;  %v410_v30 = vld [vmem:[%s4358_s2 + $0x98] sm:$0xff]  ;;  %v407_v32 = vld [vmem:[%s4358_s2 + $0x80] sm:$0xff]  ;;  %v408_v34 = vld [vmem:[%s4358_s2 + $0x88] sm:$0xff] }
  0x33   : > { %713 = vmatprep.subr.mxu0 %v346_v33  ;;  %v292_v31 = vld [vmem:[%s4357_s1 + $0x78] sm:$0xff]  ;;  %v291_v33 = vld [vmem:[%s4357_s1 + $0x70] sm:$0xff]  ;;  %v298_v40 = vld [vmem:[%s4357_s1 + $0xa8] sm:$0xff] }
  0x34   : > { %714 = vmatpush1.msra.mxu0 %v345_v35  ;;  %v294_v35 = vld [vmem:[%s4357_s1 + $0x88] sm:$0xff]  ;;  %v296_v38 = vld [vmem:[%s4357_s1 + $0x98] sm:$0xff] }
  0x35   : > { %715 = vmatprep.subr.mxu0 %v344_v36  ;;  %575 = vperm.xlu1 %3300, %v421_v4   ;;  %v293_v36 = vld [vmem:[%s4357_s1 + $0x80] sm:$0xff]  ;;  %v302_v44 = vld [vmem:[%s4357_s1 + $0xc8] sm:$0xff]  ;;  %v304_v46 = vld [vmem:[%s4357_s1 + $0xd8] sm:$0xff] }
  0x36   : > { %716 = vmatpush1.msra.mxu0 %v343_v37  ;;  %580 = vperm.xlu0 %3299, %v422_v6   ;;  %v1010_v37 = vld [vmem:[%s4360_s4] sm:$0x1f]  ;;  %v308_v50 = vld [vmem:[%s4357_s1 + $0xf8] sm:$0xff]  ;;  %v310_v52 = vld [vmem:[%s4357_s1 + $0x108] sm:$0xff] }
  0x37   : > { %717 = vmatprep.subr.mxu0 %v342_v39  ;;  %v295_v39 = vld [vmem:[%s4357_s1 + $0x90] sm:$0xff]  ;;  %v314_v56 = vld [vmem:[%s4357_s1 + $0x128] sm:$0xff]  ;;  %v316_v58 = vld [vmem:[%s4357_s1 + $0x138] sm:$0xff] }
  0x38   : > { %718 = vmatpush1.msra.mxu0 %v341_v41  ;;  %v297_v41 = vld [vmem:[%s4357_s1 + $0xa0] sm:$0xff]  ;;  %v320_v62 = vld [vmem:[%s4357_s1 + $0x158] sm:$0xff]  ;;  %v322_v0 = vld [vmem:[%s4357_s1 + $0x168] sm:$0xff] }
  0x39   : > { %2832 = vmatprep.subr.msk.mxu0 %vm680_vm1, %v390_v42  ;;  %565 = vperm.xlu1 %3300, %v419_v8   ;;  %v300_v42 = vld [vmem:[%s4357_s1 + $0xb8] sm:$0xff]  ;;  %v326_v4 = vld [vmem:[%s4357_s1 + $0x188] sm:$0xff] }
  0x3a   : > { %2833 = vmatpush2.msk.msra.mxu0 %vm680_vm1, %v389_v43  ;;  %570 = vperm.xlu0 %3299, %v420_v10   ;;  %v299_v43 = vld [vmem:[%s4357_s1 + $0xb0] sm:$0xff]  ;;  %v328_v6 = vld [vmem:[%s4357_s1 + $0x198] sm:$0xff]  ;;  %v330_v8 = vld [vmem:[%s4357_s1 + $0x1a8] sm:$0xff] }
  0x3b   : > { %735 = vmatprep.subr.mxu0 %v388_v45  ;;  %v301_v45 = vld [vmem:[%s4357_s1 + $0xc0] sm:$0xff]  ;;  %v332_v10 = vld [vmem:[%s4357_s1 + $0x1b8] sm:$0xff] }
  0x3c   : > { %736 = vmatpush2.msra.mxu0 %v387_v47  ;;  %v303_v47 = vld [vmem:[%s4357_s1 + $0xd0] sm:$0xff] }
  0x3d   : > { %737 = vmatprep.subr.mxu0 %v386_v48  ;;  %555 = vperm.xlu1 %3300, %v417_v12   ;;  %v306_v48 = vld [vmem:[%s4357_s1 + $0xe8] sm:$0xff] }
  0x3e   : > { %738 = vmatpush2.msra.mxu0 %v385_v49  ;;  %560 = vperm.xlu0 %3299, %v418_v14   ;;  %v305_v49 = vld [vmem:[%s4357_s1 + $0xe0] sm:$0xff]  ;;  %v334_v12 = vld [vmem:[%s4357_s1 + $0x1c8] sm:$0xff]  ;;  %v336_v14 = vld [vmem:[%s4357_s1 + $0x1d8] sm:$0xff] }
  0x3f   : > { %739 = vmatprep.subr.mxu0 %v384_v51  ;;  %v307_v51 = vld [vmem:[%s4357_s1 + $0xf0] sm:$0xff] }
  0x40   : > { %740 = vmatpush2.msra.mxu0 %v383_v53  ;;  %v309_v53 = vld [vmem:[%s4357_s1 + $0x100] sm:$0xff] }
  0x41   : > { %741 = vmatprep.subr.mxu0 %v382_v54  ;;  %545 = vperm.xlu1 %3300, %v415_v16   ;;  %v312_v54 = vld [vmem:[%s4357_s1 + $0x118] sm:$0xff]  ;;  %v338_v16 = vld [vmem:[%s4357_s1 + $0x1e8] sm:$0xff] }
  0x42   : > { %742 = vmatpush2.msra.mxu0 %v381_v55  ;;  %550 = vperm.xlu0 %3299, %v416_v18   ;;  %v311_v55 = vld [vmem:[%s4357_s1 + $0x110] sm:$0xff]  ;;  %v340_v18 = vld [vmem:[%s4357_s1 + $0x1f8] sm:$0xff] }
  0x43   : > { %743 = vmatprep.subr.mxu0 %v380_v57  ;;  %v313_v57 = vld [vmem:[%s4357_s1 + $0x120] sm:$0xff] }
  0x44   : > { %744 = vmatpush2.msra.mxu0 %v379_v59  ;;  %v315_v59 = vld [vmem:[%s4357_s1 + $0x130] sm:$0xff] }
  0x45   : > { %745 = vmatprep.subr.mxu0 %v378_v60  ;;  %535 = vperm.xlu1 %3300, %v413_v20   ;;  %v318_v60 = vld [vmem:[%s4357_s1 + $0x148] sm:$0xff] }
  0x46   : > { %746 = vmatpush2.msra.mxu0 %v377_v61  ;;  %540 = vperm.xlu0 %3299, %v414_v22   ;;  %v317_v61 = vld [vmem:[%s4357_s1 + $0x140] sm:$0xff] }
  0x47   : > { %747 = vmatprep.subr.mxu0 %v376_v63  ;;  %v319_v63 = vld [vmem:[%s4357_s1 + $0x150] sm:$0xff] }
  0x48   : > { %748 = vmatpush2.msra.mxu0 %v375_v1  ;;  %v321_v1 = vld [vmem:[%s4357_s1 + $0x160] sm:$0xff] }
  0x49   : > { %749 = vmatprep.subr.mxu0 %v374_v2  ;;  %525 = vperm.xlu1 %3300, %v411_v24   ;;  %v324_v2 = vld [vmem:[%s4357_s1 + $0x178] sm:$0xff] }
  0x4a   : > { %750 = vmatpush2.msra.mxu0 %v373_v3  ;;  %530 = vperm.xlu0 %3299, %v412_v26   ;;  %v323_v3 = vld [vmem:[%s4357_s1 + $0x170] sm:$0xff] }
  0x4b   : > { %752 = vmatmul.mubr.f32.vlgmr.msra.gmra.mxu0 %v277_v5  ;;  %v325_v5 = vld [vmem:[%s4357_s1 + $0x180] sm:$0xff] }
  0x4c   : > { %2835 = vmatprep.mubr.msk.f32.mxu0 %vm583_vm0, %v280_v7  ;;  %v327_v7 = vld [vmem:[%s4357_s1 + $0x190] sm:$0xff] }
  0x4d   : > { %515 = vperm.xlu1 %3300, %v409_v28  }
  0x4e   : > { %520 = vperm.xlu0 %3299, %v410_v30  }
  0x4f   : > { %758 = vmatmul.mubr.f32.gmra.mxu0 %v279_v9  ;;  %v329_v9 = vld [vmem:[%s4357_s1 + $0x1a0] sm:$0xff] }
  0x50   : > { %2836 = vmatprep.mubr.msk.f32.mxu0 %vm583_vm0, %v282_v11  ;;  %v331_v11 = vld [vmem:[%s4357_s1 + $0x1b0] sm:$0xff] }
  0x51   : > { %505 = vperm.xlu1 %3300, %v407_v32  }
  0x52   : > { %510 = vperm.xlu0 %3299, %v408_v34  }
  0x53   : > { %764 = vmatmul.mubr.f32.gmra.mxu0 %v281_v13  ;;  %v333_v13 = vld [vmem:[%s4357_s1 + $0x1c0] sm:$0xff] }
  0x54   : > { %2837 = vmatprep.mubr.msk.f32.mxu0 %vm583_vm0, %v284_v15  ;;  %v335_v15 = vld [vmem:[%s4357_s1 + $0x1d0] sm:$0xff] }
  0x56   : > { %1013 = vperm.xlu0 %3299, %v1010_v37   ;;  %v1009_v37 = vld [vmem:[%s4359_s3 + $0x8] sm:$0x1f] }
  0x57   : > { %770 = vmatmul.mubr.f32.gmra.mxu0 %v283_v17  ;;  %v337_v17 = vld [vmem:[%s4357_s1 + $0x1e0] sm:$0xff]  ;;  %1080 = vmatprep.mubr.f32.mxu1 %v1009_v37 }
  0x58   : > { %2838 = vmatprep.mubr.msk.f32.mxu0 %vm583_vm0, %v286_v19  ;;  %v339_v19 = vld [vmem:[%s4357_s1 + $0x1f0] sm:$0xff] }
  0x5b   : > { %776 = vmatmul.mubr.f32.gmra.mxu0 %v285_v21 }
  0x5c   : > { %2839 = vmatprep.mubr.msk.f32.mxu0 %vm583_vm0, %v288_v23 }
  0x5f   : > { %782 = vmatmul.mubr.f32.gmra.mxu0 %v287_v25 }
  0x60   : > { %2840 = vmatprep.mubr.msk.f32.mxu0 %vm583_vm0, %v290_v27 }
  0x63   : > { %788 = vmatmul.mubr.f32.gmra.mxu0 %v289_v29 }
  0x64   : > { %2841 = vmatprep.mubr.msk.f32.mxu0 %vm583_vm0, %v292_v31 }
  0x67   : > { %794 = vmatmul.mubr.f32.gmra.mxu0 %v291_v33 }
  0x68   : > { %2842 = vmatprep.mubr.msk.f32.mxu0 %vm583_vm0, %v294_v35 }
  0x6b   : > { %800 = vmatmul.mubr.f32.gmra.mxu0 %v293_v36 }
  0x6c   : > { %2843 = vmatprep.mubr.msk.f32.mxu0 %vm583_vm0, %v296_v38 }
  0x6f   : > { %806 = vmatmul.mubr.f32.gmra.mxu0 %v295_v39 }
  0x70   : > { %2844 = vmatprep.mubr.msk.f32.mxu0 %vm583_vm0, %v298_v40 }
  0x73   : > { %812 = vmatmul.mubr.f32.gmra.mxu0 %v297_v41 }
  0x74   : > { %2845 = vmatprep.mubr.msk.f32.mxu0 %vm583_vm0, %v300_v42 }
  0x77   : > { %818 = vmatmul.mubr.f32.gmra.mxu0 %v299_v43 }
  0x78   : > { %2846 = vmatprep.mubr.msk.f32.mxu0 %vm583_vm0, %v302_v44 }
  0x7b   : > { %824 = vmatmul.mubr.f32.gmra.mxu0 %v301_v45 }
  0x7c   : > { %2847 = vmatprep.mubr.msk.f32.mxu0 %vm583_vm0, %v304_v46 }
  0x7f   : > { %830 = vmatmul.mubr.f32.gmra.mxu0 %v303_v47 }
  0x80   : > { %2848 = vmatprep.mubr.msk.f32.mxu0 %vm583_vm0, %v306_v48 }
  0x83   : > { %836 = vmatmul.mubr.f32.gmra.mxu0 %v305_v49 }
  0x84   : > { %2849 = vmatprep.mubr.msk.f32.mxu0 %vm583_vm0, %v308_v50 }
  0x87   : > { %842 = vmatmul.mubr.f32.gmra.mxu0 %v307_v51 }
  0x88   : > { %2850 = vmatprep.mubr.msk.f32.mxu0 %vm583_vm0, %v310_v52 }
  0x8b   : > { %848 = vmatmul.mubr.f32.gmra.mxu0 %v309_v53 }
  0x8c   : > { %2851 = vmatprep.mubr.msk.f32.mxu0 %vm583_vm0, %v312_v54 }
  0x8f   : > { %854 = vmatmul.mubr.f32.gmra.mxu0 %v311_v55 }
  0x90   : > { %2852 = vmatprep.mubr.msk.f32.mxu0 %vm583_vm0, %v314_v56  ;;  %v491_v46 = vpop.permute.xlu1 %490 }
  0x91   : > { %v501_v44 = vpop.permute.xlu0 %500 }
  0x93   : > { %860 = vmatmul.mubr.f32.gmra.mxu0 %v313_v57 }
  0x94   : > { %2853 = vmatprep.mubr.msk.f32.mxu0 %vm583_vm0, %v316_v58  ;;  %v486_v51 = vpop.permute.xlu1 %485 }
  0x95   : > { %v496_v49 = vpop.permute.xlu0 %495 }
  0x97   : > { %866 = vmatmul.mubr.f32.gmra.mxu0 %v315_v59 }
  0x98   : > { %2854 = vmatprep.mubr.msk.f32.mxu0 %vm583_vm0, %v318_v60  ;;  %v476_v56 = vpop.permute.xlu1 %475 }
  0x99   : > { %v481_v54 = vpop.permute.xlu0 %480 }
  0x9b   : > { %872 = vmatmul.mubr.f32.gmra.mxu0 %v317_v61 }
  0x9c   : > { %2855 = vmatprep.mubr.msk.f32.mxu0 %vm583_vm0, %v320_v62 }
  0x9d   : > { %v471_v60 = vpop.permute.xlu0 %470 }
  0x9f   : > { %878 = vmatmul.mubr.f32.gmra.mxu0 %v319_v63 }
  0xa0   : > { %2856 = vmatprep.mubr.msk.f32.mxu0 %vm583_vm0, %v322_v0 }
  0xa3   : > { %884 = vmatmul.mubr.f32.gmra.mxu0 %v321_v1  ;;  %v466_v1 = vpop.permute.xlu1 %465 }
  0xa4   : > { %2857 = vmatprep.mubr.msk.f32.mxu0 %vm583_vm0, %v324_v2 }
  0xa7   : > { %890 = vmatmul.mubr.f32.gmra.mxu0 %v323_v3 }
  0xa8   : > { %2858 = vmatprep.mubr.msk.f32.mxu0 %vm583_vm0, %v326_v4 }
  0xab   : > { %896 = vmatmul.mubr.f32.gmra.mxu0 %v325_v5 }
  0xac   : > { %2859 = vmatprep.mubr.msk.f32.mxu0 %vm583_vm0, %v328_v6 }
  0xaf   : > { %902 = vmatmul.mubr.f32.gmra.mxu0 %v327_v7 }
  0xb0   : > { %2860 = vmatprep.mubr.msk.f32.mxu0 %vm583_vm0, %v330_v8 }
  0xb3   : > { %908 = vmatmul.mubr.f32.gmra.mxu0 %v329_v9 }
  0xb4   : > { %2861 = vmatprep.mubr.msk.f32.mxu0 %vm583_vm0, %v332_v10 }
  0xb7   : > { %914 = vmatmul.mubr.f32.gmra.mxu0 %v331_v11 }
  0xb8   : > { %2862 = vmatprep.mubr.msk.f32.mxu0 %vm583_vm0, %v334_v12  ;;  %v461_v12 = vpop.permute.xlu0 %460 }
  0xbb   : > { %920 = vmatmul.mubr.f32.gmra.mxu0 %v333_v13 }
  0xbc   : > { %2863 = vmatprep.mubr.msk.f32.mxu0 %vm583_vm0, %v336_v14 }
  0xbf   : > { %926 = vmatmul.mubr.f32.gmra.mxu0 %v335_v15 }
  0xc0   : > { %2864 = vmatprep.mubr.msk.f32.mxu0 %vm583_vm0, %v338_v16 }
  0xc3   : > { %932 = vmatmul.mubr.f32.gmra.mxu0 %v337_v17 }
  0xc4   : > { %2865 = vmatprep.mubr.msk.f32.mxu0 %vm583_vm0, %v340_v18  ;;  %v456_v18 = vpop.permute.xlu1 %455 }
  0xc7   : > { %938 = vmatmul.mubr.f32.gmra.mxu0 %v339_v19 }
 0x10b   : > { %v3844_v20 = vpop.f32.mrf.mxu0 }
 0x10d   : > { %v3846_v21 = vpop.f32.mrf.mxu0 }
 0x10f   : > { %v3848_v22 = vpop.f32.mrf.mxu0 }
 0x111   : > { %v3850_v23 = vpop.f32.mrf.mxu0 }
 0x113   : > { %v3852_v24 = vpop.f32.mrf.mxu0 }
 0x115   : > { %v3854_v25 = vpop.f32.mrf.mxu0 }
 0x117   : > { %v3856_v26 = vpop.f32.mrf.mxu0 }
 0x119   : > { %v3858_v27 = vpop.f32.mrf.mxu0 }
 0x11b   : > { %v3860_v28 = vpop.f32.mrf.mxu0 }
 0x11d   : > { %v3862_v29 = vpop.f32.mrf.mxu0 }
 0x11f   : > { %v3864_v30 = vpop.f32.mrf.mxu0 }
 0x121   : > { %v3866_v31 = vpop.f32.mrf.mxu0 }
 0x123   : > { %v3868_v32 = vpop.f32.mrf.mxu0 }
 0x125   : > { %v3870_v33 = vpop.f32.mrf.mxu0 }
 0x127   : > { %v3872_v34 = vpop.f32.mrf.mxu0 }
 0x129   : > { %v3874_v35 = vpop.f32.mrf.mxu0 }
 0x12b   : > { %v3876_v36 = vpop.f32.mrf.mxu0 }
 0x12d   : > { %v3881_v38 = vpop.f32.mrf.mxu0 }
 0x12f   : > { %v807_v39 = vpop.f32.mrf.mxu0 }
 0x131   : > { %v809_v40 = vpop.f32.mrf.mxu0 }
 0x133   : > { %v813_v41 = vpop.f32.mrf.mxu0 }
 0x135   : > { %v815_v42 = vpop.f32.mrf.mxu0 }
 0x136   : > { %v816_v19 = vadd.f32 %v815_v42, %v476_v56  ;;  %v802_v42 = vadd.f32 %v3876_v36, %v466_v1  ;;  %v790_v36 = vadd.f32 %v3868_v32, %v456_v18 }
 0x137   : > { %v819_v43 = vpop.f32.mrf.mxu0 }
 0x138   : > { %v820_v15 = vadd.f32 %v819_v43, %v481_v54  ;;  %v451_v43 = vpop.permute.xlu0 %450 }
 0x139   : > { %v821_v45 = vpop.f32.mrf.mxu0 }
 0x13a   : > { %v822_v13 = vadd.f32 %v821_v45, %v481_v54  ;;  %v808_v45 = vadd.f32 %v807_v39, %v471_v60  ;;  %v796_v39 = vadd.f32 %v3872_v34, %v461_v12  ;;  %v784_v34 = vadd.f32 %v3864_v30, %v451_v43 }
 0x13b   : > { %v825_v47 = vpop.f32.mrf.mxu0 }
 0x13c   : > { %v826_v9 = vadd.f32 %v825_v47, %v486_v51 }
 0x13d   : > { %v827_v48 = vpop.f32.mrf.mxu0 }
 0x13e   : > { %v828_v7 = vadd.f32 %v827_v48, %v486_v51  ;;  %v810_v48 = vadd.f32 %v809_v40, %v471_v60  ;;  %v798_v40 = vadd.f32 %v3874_v35, %v461_v12  ;;  %v960_v60 = vmax.f32 %v802_v42, 0.0 }
 0x13f   : > { %v831_v50 = vpop.f32.mrf.mxu0  ;;  %v786_v35 = vadd.f32 %v3866_v31, %v451_v43 }
 0x140   : > { %v832_v4 = vadd.f32 %v831_v50, %v491_v46  ;;  %v969_v37 = vmax.f32 %v828_v7, 0.0  ;;  %v966_v50 = vmax.f32 %v820_v15, 0.0 }
 0x141   : > { %v833_v52 = vpop.f32.mrf.mxu0 }
 0x142   : > { %v834_v2 = vadd.f32 %v833_v52, %v491_v46  ;;  %v970_v16 = vmax.f32 %v832_v4, 0.0  ;;  %v968_v46 = vmax.f32 %v826_v9, 0.0  ;;  %v804_v52 = vadd.f32 %v3881_v38, %v466_v1 }
 0x143   : > { %v837_v53 = vpop.f32.mrf.mxu0  ;;  %v792_v38 = vadd.f32 %v3870_v33, %v456_v18  ;;  %v958_v1 = vmax.f32 %v796_v39, 0.0  ;;  %v954_v9 = vmax.f32 %v784_v34, 0.0 }
 0x144   : > { %v838_v63 = vadd.f32 %v837_v53, %v496_v49  ;;  %v971_v14 = vmax.f32 %v834_v2, 0.0  ;;  %v965_v53 = vmax.f32 %v816_v19, 0.0 }
 0x145   : > { %v839_v55 = vpop.f32.mrf.mxu0  ;;  %v957_v4 = vmax.f32 %v792_v38, 0.0 }
 0x146   : > { %v840_v61 = vadd.f32 %v839_v55, %v496_v49  ;;  %v972_v10 = vmax.f32 %v838_v63, 0.0  ;;  %v967_v49 = vmax.f32 %v822_v13, 0.0  ;;  %v446_v55 = vpop.permute.xlu1 %445  ;;  %v959_v63 = vmax.f32 %v798_v40, 0.0 }
 0x147   : > { %v843_v57 = vpop.f32.mrf.mxu0  ;;  %v778_v32 = vadd.f32 %v3860_v28, %v446_v55 }
 0x148   : > { %v844_v58 = vadd.f32 %v843_v57, %v501_v44  ;;  %v973_v8 = vmax.f32 %v840_v61, 0.0  ;;  %v962_v57 = vmax.f32 %v808_v45, 0.0 }
 0x149   : > { %v845_v59 = vpop.f32.mrf.mxu0 }
 0x14a   : > { %v846_v62 = vadd.f32 %v845_v59, %v501_v44  ;;  %v974_v5 = vmax.f32 %v844_v58, 0.0  ;;  %v814_v44 = vadd.f32 %v813_v41, %v476_v56  ;;  %v963_v56 = vmax.f32 %v810_v48, 0.0  ;;  %v436_v33 = vpop.permute.xlu1 %435 }
 0x14b   : > { %v3883_v0 = vpop.f32.mrf.mxu0  ;;  %v961_v59 = vmax.f32 %v804_v52, 0.0  ;;  %v766_v28 = vadd.f32 %v3852_v24, %v436_v33 }
 0x14c   : > { %v975_v3 = vmax.f32 %v846_v62, 0.0  ;;  %v964_v41 = vmax.f32 %v814_v44, 0.0  ;;  %v441_v62 = vpop.permute.xlu0 %440 }
 0x14d   : > { %v3885_v6 = vpop.f32.mrf.mxu0  ;;  %v774_v31 = vadd.f32 %v3858_v27, %v441_v62  ;;  %v772_v30 = vadd.f32 %v3856_v26, %v441_v62 }
 0x14e   : > { %1016 = vmatprep.subr.mxu1 %v975_v3  ;;  %v780_v3 = vadd.f32 %v3862_v29, %v446_v55  ;;  %v768_v29 = vadd.f32 %v3854_v25, %v436_v33  ;;  %v426_v27 = vpop.permute.xlu1 %425 }
 0x14f   : > { %v3887_v11 = vpop.f32.mrf.mxu0  ;;  %1017 = vmatpush1.msra.mxu1 %v974_v5  ;;  %v956_v5 = vmax.f32 %v790_v36, 0.0  ;;  %v951_v18 = vmax.f32 %v774_v31, 0.0  ;;  %v950_v19 = vmax.f32 %v772_v30, 0.0  ;;  %v756_v25 = vadd.f32 %v3846_v21, %v426_v27 }
 0x150   : > { %1018 = vmatprep.subr.mxu1 %v973_v8  ;;  %v955_v8 = vmax.f32 %v786_v35, 0.0  ;;  %v431_v12 = vpop.permute.xlu0 %430  ;;  %v953_v13 = vmax.f32 %v780_v3, 0.0  ;;  %v949_v44 = vmax.f32 %v768_v29, 0.0  ;;  %v754_v24 = vadd.f32 %v3844_v20, %v426_v27 }
 0x151   : > { %v3889_v17 = vpop.f32.mrf.mxu0  ;;  %1019 = vmatpush1.msra.mxu1 %v972_v10  ;;  %v760_v26 = vadd.f32 %v3848_v22, %v431_v12  ;;  %v945_v22 = vmax.f32 %v756_v25, 0.0 }
 0x152   : > { %1020 = vmatprep.subr.mxu1 %v971_v14  ;;  %v952_v14 = vmax.f32 %v778_v32, 0.0 }
 0x153   : > { %v3891_v47 = vpop.f32.mrf.mxu0  ;;  %1021 = vmatpush1.msra.mxu1 %v970_v16  ;;  %v762_v16 = vadd.f32 %v3850_v23, %v431_v12  ;;  %v946_v23 = vmax.f32 %v760_v26, 0.0 }
 0x154   : > { %1022 = vmatprep.subr.mxu1 %v969_v37  ;;  %v581_v55 = vpop.permute.xlu0 %580 }
 0x155   : > { %v3893_v51 = vpop.f32.mrf.mxu0  ;;  %1023 = vmatpush1.msra.mxu1 %v968_v46  ;;  %v948_v46 = vmax.f32 %v766_v28, 0.0 }
 0x156   : > { %1024 = vmatprep.subr.mxu1 %v967_v49  ;;  %v947_v49 = vmax.f32 %v762_v16, 0.0 }
 0x157   : > { %v3897_v54 = vpop.f32.mrf.mxu0  ;;  %1025 = vmatpush1.msra.mxu1 %v966_v50  ;;  %v944_v50 = vmax.f32 %v754_v24, 0.0 }
 0x158   : > { %1026 = vmatprep.subr.mxu1 %v965_v53  ;;  %v571_v38 = vpop.permute.xlu0 %570 }
 0x159   : > { %v3901_v58 = vpop.f32.mrf.mxu0  ;;  %1027 = vmatpush1.msra.mxu1 %v964_v41 }
 0x15a   : > { %1028 = vmatprep.subr.mxu1 %v963_v56  ;;  %v576_v56 = vpop.permute.xlu1 %575 }
 0x15b   : > { %v3905_v61 = vpop.f32.mrf.mxu0  ;;  %1029 = vmatpush1.msra.mxu1 %v962_v57 }
 0x15c   : > { %1030 = vmatprep.subr.mxu1 %v961_v59  ;;  %v561_v35 = vpop.permute.xlu0 %560 }
 0x15d   : > { %v3909_v2 = vpop.f32.mrf.mxu0  ;;  %1031 = vmatpush1.msra.mxu1 %v960_v60 }
 0x15e   : > { %1032 = vmatprep.subr.mxu1 %v959_v63  ;;  %v566_v36 = vpop.permute.xlu1 %565 }
 0x15f   : > { %v3913_v7 = vpop.f32.mrf.mxu0  ;;  %1033 = vmatpush1.msra.mxu1 %v958_v1 }
 0x160   : > { %1034 = vmatprep.subr.mxu1 %v957_v4  ;;  %v551_v4 = vpop.permute.xlu0 %550 }
 0x161   : > { %v3917_v10 = vpop.f32.mrf.mxu0  ;;  %1035 = vmatpush1.msra.mxu1 %v956_v5 }
 0x162   : > { %1036 = vmatprep.subr.mxu1 %v955_v8  ;;  %v556_v34 = vpop.permute.xlu1 %555 }
 0x163   : > { %v3921_v15 = vpop.f32.mrf.mxu0  ;;  %1037 = vmatpush1.msra.mxu1 %v954_v9 }
 0x164   : > { %1038 = vmatprep.subr.mxu1 %v953_v13  ;;  %v541_v16 = vpop.permute.xlu0 %540 }
 0x165   : > { %v3925_v37 = vpop.f32.mrf.mxu0  ;;  %1039 = vmatpush1.msra.mxu1 %v952_v14 }
 0x166   : > { %1040 = vmatprep.subr.mxu1 %v951_v18  ;;  %v546_v8 = vpop.permute.xlu1 %545 }
 0x167   : > { %v3929_v48 = vpop.f32.mrf.mxu0  ;;  %1041 = vmatpush1.msra.mxu1 %v950_v19 }
 0x168   : > { %1042 = vmatprep.subr.mxu1 %v949_v44 }
 0x169   : > { %v3931_v45 = vpop.f32.mrf.mxu0  ;;  %1043 = vmatpush1.msra.mxu1 %v948_v46 }
 0x16a   : > { %1044 = vmatprep.subr.mxu1 %v947_v49  ;;  %v536_v44 = vpop.permute.xlu1 %535 }
 0x16b   : > { %v3933_v43 = vpop.f32.mrf.mxu0  ;;  %1045 = vmatpush1.msra.mxu1 %v946_v23 }
 0x16c   : > { %1046 = vmatprep.subr.mxu1 %v945_v22 }
 0x16d   : > { %v899_v21 = vpop.f32.mrf.mxu0  ;;  %1047 = vmatpush1.msra.mxu1 %v944_v50 }
 0x16f   : > { %v903_v20 = vpop.f32.mrf.mxu0 }
 0x171   : > { %v905_v52 = vpop.f32.mrf.mxu0 }
 0x172   : > { %v906_v22 = vadd.f32 %v905_v52, %v551_v4  ;;  %v892_v52 = vadd.f32 %v3929_v48, %v541_v16 }
 0x173   : > { %v909_v53 = vpop.f32.mrf.mxu0 }
 0x174   : > { %v910_v49 = vadd.f32 %v909_v53, %v556_v34  ;;  %v995_v53 = vmax.f32 %v906_v22, 0.0 }
 0x175   : > { %v911_v42 = vpop.f32.mrf.mxu0 }
 0x176   : > { %v912_v24 = vadd.f32 %v911_v42, %v556_v34  ;;  %v526_v42 = vpop.permute.xlu1 %525  ;;  %v990_v34 = vmax.f32 %v892_v52, 0.0 }
 0x177   : > { %v915_v41 = vpop.f32.mrf.mxu0 }
 0x178   : > { %v916_v19 = vadd.f32 %v915_v41, %v561_v35  ;;  %v898_v41 = vadd.f32 %v3933_v43, %v546_v8 }
 0x179   : > { %v917_v40 = vpop.f32.mrf.mxu0 }
 0x17a   : > { %v918_v18 = vadd.f32 %v917_v40, %v561_v35  ;;  %v900_v40 = vadd.f32 %v899_v21, %v546_v8  ;;  %v886_v21 = vadd.f32 %v3921_v15, %v536_v44  ;;  %v516_v48 = vpop.permute.xlu1 %515 }
 0x17b   : > { %v921_v39 = vpop.f32.mrf.mxu0 }
 0x17c   : > { %v922_v14 = vadd.f32 %v921_v39, %v566_v36  ;;  %v999_v50 = vmax.f32 %v918_v18, 0.0  ;;  %v531_v39 = vpop.permute.xlu0 %530 }
 0x17d   : > { %v923_v57 = vpop.f32.mrf.mxu0  ;;  %v882_v35 = vadd.f32 %v3917_v10, %v531_v39 }
 0x17e   : > { %v924_v13 = vadd.f32 %v923_v57, %v566_v36  ;;  %v1000_v23 = vmax.f32 %v922_v14, 0.0  ;;  %v997_v57 = vmax.f32 %v912_v24, 0.0 }
 0x17f   : > { %v927_v59 = vpop.f32.mrf.mxu0 }
 0x180   : > { %v928_v12 = vadd.f32 %v927_v59, %v571_v38  ;;  %v1001_v46 = vmax.f32 %v924_v13, 0.0  ;;  %v894_v59 = vadd.f32 %v3931_v45, %v541_v16  ;;  %v521_v43 = vpop.permute.xlu0 %520  ;;  %v880_v45 = vadd.f32 %v3913_v7, %v531_v39 }
 0x181   : > { %v929_v60 = vpop.f32.mrf.mxu0  ;;  %v870_v15 = vadd.f32 %v3901_v58, %v521_v43  ;;  %v868_v10 = vadd.f32 %v3897_v54, %v521_v43 }
 0x182   : > { %v930_v30 = vadd.f32 %v929_v60, %v571_v38  ;;  %v1002_v25 = vmax.f32 %v928_v12, 0.0  ;;  %v996_v38 = vmax.f32 %v910_v49, 0.0  ;;  %v993_v60 = vmax.f32 %v900_v40, 0.0 }
 0x183   : > { %v933_v62 = vpop.f32.mrf.mxu0  ;;  %v982_v12 = vmax.f32 %v868_v10, 0.0 }
 0x184   : > { %v934_v31 = vadd.f32 %v933_v62, %v576_v56  ;;  %v1003_v26 = vmax.f32 %v930_v30, 0.0  ;;  %v992_v62 = vmax.f32 %v898_v41, 0.0  ;;  %v511_v7 = vpop.permute.xlu0 %510 }
 0x185   : > { %v935_v63 = vpop.f32.mrf.mxu0  ;;  %v858_v30 = vadd.f32 %v3889_v17, %v511_v7  ;;  %v856_v58 = vadd.f32 %v3887_v11, %v511_v7  ;;  %v1008_v11 = vld [vmem:[%s4359_s3] sm:$0x1f] }
 0x186   : > { %v936_v32 = vadd.f32 %v935_v63, %v576_v56  ;;  %v1004_v27 = vmax.f32 %v934_v31, 0.0  ;;  %v998_v56 = vmax.f32 %v916_v19, 0.0  ;;  %v991_v63 = vmax.f32 %v894_v59, 0.0  ;;  %v3965_v19 = vld [vmem:[%s4362_s6 + $0x8] sm:$0xff] }
 0x187   : > { %v939_v1 = vpop.f32.mrf.mxu0  ;;  %3193 = vmatprep.subr.mxu0 %v3965_v19 }
 0x188   : > { %v940_v33 = vadd.f32 %v939_v1, %v581_v55  ;;  %v1005_v28 = vmax.f32 %v936_v32, 0.0  ;;  %v876_v1 = vadd.f32 %v3909_v2, %v526_v42  ;;  %v986_v32 = vmax.f32 %v880_v45, 0.0  ;;  %3194 = vmatpush3.msra.mxu0 %v3965_v19 }
 0x189   : > { %v941_v3 = vpop.f32.mrf.mxu0  ;;  %v862_v2 = vadd.f32 %v3891_v47, %v516_v48  ;;  %v979_v47 = vmax.f32 %v858_v30, 0.0 }
 0x18a   : > { %v942_v5 = vadd.f32 %v941_v3, %v581_v55  ;;  %v1006_v29 = vmax.f32 %v940_v33, 0.0  ;;  %v904_v55 = vadd.f32 %v903_v20, %v551_v4  ;;  %v888_v20 = vadd.f32 %v3925_v37, %v536_v44 }
 0x18b   : > { %v874_v37 = vadd.f32 %v3905_v61, %v526_v42  ;;  %v988_v3 = vmax.f32 %v886_v21, 0.0  ;;  %v987_v4 = vmax.f32 %v882_v35, 0.0  ;;  %v985_v31 = vmax.f32 %v876_v1, 0.0  ;;  %v506_v61 = vpop.permute.xlu1 %505 }
 0x18c   : > { %v1007_v9 = vmax.f32 %v942_v5, 0.0  ;;  %v994_v36 = vmax.f32 %v904_v55, 0.0  ;;  %v989_v33 = vmax.f32 %v888_v20, 0.0  ;;  %v864_v5 = vadd.f32 %v3893_v51, %v516_v48 }
 0x18d   : > { %v984_v8 = vmax.f32 %v874_v37, 0.0  ;;  %v852_v54 = vadd.f32 %v3885_v6, %v506_v61  ;;  %v850_v51 = vadd.f32 %v3883_v0, %v506_v61  ;;  %v980_v13 = vmax.f32 %v862_v2, 0.0  ;;  %v1014_v6 = vpop.permute.xlu0 %1013 }
 0x18e   : > { %1048 = vmatprep.subr.mxu1 %v1007_v9  ;;  %v983_v9 = vmax.f32 %v870_v15, 0.0  ;;  %v3371_v44 = vmov 1983009808  }
 0x18f   : > { %1049 = vmatpush2.msra.mxu1 %v1006_v29  ;;  %v981_v29 = vmax.f32 %v864_v5, 0.0  ;;  %v977_v14 = vmax.f32 %v852_v54, 0.0  ;;  %v976_v17 = vmax.f32 %v850_v51, 0.0  ;;  %v1134_v24 = vunpack.c.l.s4 %v3371_v44 }
 0x190   : > { %1050 = vmatprep.subr.mxu1 %v1005_v28  ;;  %v978_v28 = vmax.f32 %v856_v58, 0.0 }
 0x191   : > { %1051 = vmatpush2.msra.mxu1 %v1004_v27  ;;  %v1135_v49 = vunpack.c.0.s8 %v1134_v24 }
 0x192   : > { %1052 = vmatprep.subr.mxu1 %v1003_v26  ;;  %v3958_v26 = vld [vmem:[%s4361_s5] sm:$0xff] }
 0x193   : > { %1053 = vmatpush2.msra.mxu1 %v1002_v25  ;;  %v3971_v25 = vld [vmem:[%s4362_s6] sm:$0xff] }
 0x194   : > { %1054 = vmatprep.subr.mxu1 %v1001_v46  ;;  %3195 = vmatprep.subr.mxu0 %v3971_v25  ;;  %v1136_v46 = vlaneseq }
 0x195   : > { %1055 = vmatpush2.msra.mxu1 %v1000_v23  ;;  %3196 = vmatpush3.msra.mxu0 %v3971_v25 }
 0x196   : > { %1056 = vmatprep.subr.mxu1 %v999_v50  ;;  %3225 = vmatprep.subr.mxu0 %v3965_v19  ;;  %v1137_v23 = vshrl.u32 %v1136_v46, 7  ;;  %v3372_v50 = vmov 1934713408  }
 0x197   : > { %1057 = vmatpush2.msra.mxu1 %v998_v56  ;;  %v1198_v55 = vunpack.c.l.s4 %v3372_v50 }
 0x198   : > { %1058 = vmatprep.subr.mxu1 %v997_v57  ;;  %v3977_v22 = vsub.s32 %v1135_v49, %v1137_v23 }
 0x199   : > { %1059 = vmatpush2.msra.mxu1 %v996_v38  ;;  %v1199_v38 = vunpack.c.0.s8 %v1198_v55 }
 0x19a   : > { %1060 = vmatprep.subr.mxu1 %v995_v53 }
 0x19b   : > { %1061 = vmatpush2.msra.mxu1 %v994_v36  ;;  %v3987_v21 = vsub.s32 %v1199_v38, %v1137_v23 }
 0x19c   : > { %1062 = vmatprep.subr.mxu1 %v993_v60 }
 0x19d   : > { %1063 = vmatpush2.msra.mxu1 %v992_v62 }
 0x19e   : > { %1064 = vmatprep.subr.mxu1 %v991_v63 }
 0x19f   : > { %1065 = vmatpush2.msra.mxu1 %v990_v34 }
 0x1a0   : > { %1066 = vmatprep.subr.mxu1 %v989_v33 }
 0x1a1   : > { %1067 = vmatpush2.msra.mxu1 %v988_v3 }
 0x1a2   : > { %1068 = vmatprep.subr.mxu1 %v987_v4 }
 0x1a3   : > { %1069 = vmatpush2.msra.mxu1 %v986_v32 }
 0x1a4   : > { %1070 = vmatprep.subr.mxu1 %v985_v31 }
 0x1a5   : > { %1071 = vmatpush2.msra.mxu1 %v984_v8 }
 0x1a6   : > { %1072 = vmatprep.subr.mxu1 %v983_v9 }
 0x1a7   : > { %1073 = vmatpush2.msra.mxu1 %v982_v12 }
 0x1a8   : > { %1074 = vmatprep.subr.mxu1 %v981_v29 }
 0x1a9   : > { %1075 = vmatpush2.msra.mxu1 %v980_v13 }
 0x1aa   : > { %1076 = vmatprep.subr.mxu1 %v979_v47 }
 0x1ab   : > { %1077 = vmatpush2.msra.mxu1 %v978_v28 }
 0x1ac   : > { %1078 = vmatprep.subr.mxu1 %v977_v14 }
 0x1ad   : > { %1079 = vmatpush2.msra.mxu1 %v976_v17 }
 0x1ae   : > { %1081 = vmatmul.mubr.f32.vlgmr.msra.gmra.mxu1 %v1008_v11 }
 0x1af   : > { %3085 = vmatprep.mubr.msk.f32.mxu1 %vm1373_vm2, %v3958_v26 }
 0x26e   : > { %v1082_v27 = vpop.f32.mrf.mxu1 }
 0x26f   : > { %v1083_v0 = vadd.f32 %v1082_v27, %v1014_v6 }
 0x270   : > { %v1084_v16 = vpop.f32.mrf.mxu1 }
 0x271   : > { %1091 = vrot.lane.b32.xlu1 %v1083_v0, %s3364_s22  ;;  %1088 = vrot.lane.b32.xlu0 %v1083_v0, %s3365_s23  ;;  %v1085_v18 = vadd.f32 %v1084_v16, %v1014_v6 }
 0x275   : > { %1097 = vrot.lane.b32.xlu1 %v1083_v0, %s3366_s29  ;;  %1094 = vrot.lane.b32.xlu0 %v1083_v0, %s3367_s8 }
 0x279   : > { %1110 = vrot.lane.b32.xlu1 %v1085_v18, %s3365_s23  ;;  %1100 = vrot.lane.b32.xlu0 %v1083_v0, %s3368_s9 }
 0x27d   : > { %1116 = vrot.lane.b32.xlu1 %v1085_v18, %s3367_s8  ;;  %1113 = vrot.lane.b32.xlu0 %v1085_v18, %s3364_s22  ;;  %s3245_s22 = smul.u32 320, %s269_s21 }
 0x27f   : > { %s4121_s23 = scalar_lea.vmem [#allocation2], %s3245_s22 }
 0x280   : > { %s2765_s8 = sshll.u32 %s4121_s23, 4  ;;  %s4308_s8 = int_to_ptr.vmem [resolvable:$true] %s2765_s8 }
 0x281   : > { %1122 = vrot.lane.b32.xlu1 %v1085_v18, %s3368_s9  ;;  %1119 = vrot.lane.b32.xlu0 %v1085_v18, %s3366_s29  ;;  %s3247_s29 = smul.u32 5120, %s3437_s28  ;;  %s4316_s28 = scalar_lea.sflag [#allocation3], %s269_s21 }
 0x282   : > { %s3301_s15 = scalar_lea.vmem %s4308_s8, 5120  ;;  %p3308_p0 = scmp.lt.s32.totalorder %s4308_s8, %s3306_s17 }
 0x283   : > { %p3302_p11 = scmp.ne.s32.totalorder %s4308_s8, %s3301_s15  ;;  %p3309_p1 = scmp.lt.s32.totalorder %s3307_s18, %s3301_s15 }
 0x285   : > { %1128 = vrot.lane.b32.xlu1 %v1085_v18, %s3369_s13  ;;  %1125 = vrot.lane.b32.xlu0 %v1085_v18, %s3370_s14  ;;  %p3303_p12 = pnand %p3302_p11, %p3454_p5  ;;  %p3310_p2 = por %p3309_p1, %p3308_p0 }
 0x287   : > { %p3304_p13 = pneg %p3303_p12 }
 0x289   : > { %1103 = vrot.lane.b32.xlu1 %v1083_v0, %s3370_s14  ;;  %1106 = vrot.lane.b32.xlu0 %v1083_v0, %s3369_s13  ;;  %s4306_s14 = scalar_lea.hbm %s4363_s7, %s3247_s29  ;;  %p3311_p3 = pnand %p3310_p2, %p3304_p13 }
 0x2e3   : > { %v1092_v56 = vpop.permute.xlu1 %1091  ;;  %v1089_v39 = vpop.permute.xlu0 %1088 }
 0x2e4   : > { %v1132_v40 = vcombine.high %v1083_v0, %v1092_v56  ;;  %v1131_v57 = vcombine.low %v1083_v0, %v1092_v56 }
 0x2e6   : > { %v1146_v41 = vrot.slane %v1132_v40, %v3977_v22  ;;  %v3981_v36 = vrot.slane %v1131_v57, %v3977_v22 }
 0x2e7   : > { %v1098_v42 = vpop.permute.xlu1 %1097  ;;  %v1095_v59 = vpop.permute.xlu0 %1094 }
 0x2e8   : > { %v1147_v53 = vcombine.low %v1089_v39, %v1095_v59  ;;  %v1148_v52 = vcombine.high %v1089_v39, %v1095_v59 }
 0x2ea   : > { %v3984_v20 = vrot.slane %v1147_v53, %v3977_v22  ;;  %v1162_v60 = vrot.slane %v1148_v52, %v3977_v22 }
 0x2eb   : > { %v1111_v62 = vpop.permute.xlu1 %1110  ;;  %v1101_v43 = vpop.permute.xlu0 %1100 }
 0x2ec   : > { %v1196_v35 = vcombine.high %v3981_v36, %v3984_v20  ;;  %v1211_v63 = vcombine.low %v1146_v41, %v1162_v60  ;;  %v1195_v39 = vcombine.low %v3981_v36, %v3984_v20 }
 0x2ee   : > { %v3992_v45 = vrot.slane %v1196_v35, %v3987_v21  ;;  %v3995_v34 = vrot.slane %v1211_v63, %v3987_v21  ;;  %v1203_v36 = vrot.slane %v1195_v39, %v3987_v21 }
 0x2ef   : > { %v1117_v48 = vpop.permute.xlu1 %1116  ;;  %v1114_v1 = vpop.permute.xlu0 %1113 }
 0x2f0   : > { %v1264_v33 = vcombine.low %v1111_v62, %v1117_v48  ;;  %v1265_v37 = vcombine.high %v1111_v62, %v1117_v48  ;;  %v1248_v3 = vcombine.low %v1085_v18, %v1114_v1  ;;  %v1249_v15 = vcombine.high %v1085_v18, %v1114_v1 }
 0x2f2   : > { %v1272_v4 = vrot.slane %v1264_v33, %v3977_v22  ;;  %v1279_v10 = vrot.slane %v1265_v37, %v3977_v22  ;;  %v1256_v32 = vrot.slane %v1248_v3, %v3977_v22  ;;  %v1263_v7 = vrot.slane %v1249_v15, %v3977_v22  ;;  %v4036_v33 = vld [vmem:[%s4361_s5 + $0x8] sm:$0xff]  ;;  %v4061_v3 = vld [vmem:[%s4361_s5 + $0x20] sm:$0xff] }
 0x2f3   : > { %v1123_v5 = vpop.permute.xlu1 %1122  ;;  %v1120_v31 = vpop.permute.xlu0 %1119  ;;  %v4071_v15 = vld [vmem:[%s4361_s5 + $0x28] sm:$0xff] }
 0x2f4   : > { %v1313_v2 = vcombine.high %v1256_v32, %v1272_v4  ;;  %v1328_v8 = vcombine.low %v1263_v7, %v1279_v10  ;;  %v1312_v13 = vcombine.low %v1256_v32, %v1272_v4  ;;  %v4076_v4 = vld [vmem:[%s4361_s5 + $0x30] sm:$0xff]  ;;  %v4085_v10 = vld [vmem:[%s4361_s5 + $0x38] sm:$0xff] }
 0x2f6   : > { %v1327_v61 = vrot.slane %v1313_v2, %v3987_v21  ;;  %v1335_v30 = vrot.slane %v1328_v8, %v3987_v21  ;;  %v1320_v49 = vrot.slane %v1312_v13, %v3987_v21 }
 0x2f7   : > { %v1129_v9 = vpop.permute.xlu1 %1128  ;;  %v1126_v58 = vpop.permute.xlu0 %1125 }
 0x2f8   : > { %v1296_v12 = vcombine.low %v1123_v5, %v1129_v9  ;;  %v1297_v54 = vcombine.high %v1123_v5, %v1129_v9  ;;  %v1280_v29 = vcombine.low %v1120_v31, %v1126_v58  ;;  %v1281_v51 = vcombine.high %v1120_v31, %v1126_v58 }
 0x2fa   : > { %v1304_v47 = vrot.slane %v1296_v12, %v3977_v22  ;;  %v1311_v28 = vrot.slane %v1297_v54, %v3977_v22  ;;  %v1288_v14 = vrot.slane %v1280_v29, %v3977_v22  ;;  %v1295_v17 = vrot.slane %v1281_v51, %v3977_v22 }
 0x2fb   : > { %v1104_v11 = vpop.permute.xlu1 %1103  ;;  %v1107_v6 = vpop.permute.xlu0 %1106 }
 0x2fc   : > { %v1336_v27 = vcombine.low %v1288_v14, %v1304_v47  ;;  %v1337_v0 = vcombine.high %v1288_v14, %v1304_v47  ;;  %v1352_v16 = vcombine.low %v1295_v17, %v1311_v28  ;;  %v1163_v18 = vcombine.low %v1098_v42, %v1104_v11 }
 0x2fd   : > { %v1164_v44 = vcombine.high %v1098_v42, %v1104_v11  ;;  %v1179_v24 = vcombine.low %v1101_v43, %v1107_v6  ;;  %v1180_v46 = vcombine.high %v1101_v43, %v1107_v6 }
 0x2fe   : > { %v1171_v23 = vrot.slane %v1163_v18, %v3977_v22  ;;  %v1344_v50 = vrot.slane %v1336_v27, %v3987_v21  ;;  %v1351_v55 = vrot.slane %v1337_v0, %v3987_v21  ;;  %v1359_v56 = vrot.slane %v1352_v16, %v3987_v21 }
 0x2ff   : > { %v1178_v40 = vrot.slane %v1164_v44, %v3977_v22  ;;  %v1187_v57 = vrot.slane %v1179_v24, %v3977_v22  ;;  %v1194_v41 = vrot.slane %v1180_v46, %v3977_v22 }
 0x300   : > { %v1360_v38 = vcombine.low %v1320_v49, %v1344_v50  ;;  %v4017_v42 = vcombine.low %v1327_v61, %v1351_v55  ;;  %v4019_v59 = vcombine.high %v1327_v61, %v1351_v55  ;;  %v4021_v62 = vcombine.low %v1335_v30, %v1359_v56 }
 0x301   : > { %v1219_v53 = vcombine.low %v1171_v23, %v1187_v57  ;;  %v1220_v52 = vcombine.high %v1171_v23, %v1187_v57  ;;  %v1235_v60 = vcombine.low %v1178_v40, %v1194_v41 }
 0x302   : > { %3081 = vmatprep.subr.mxu1 %v1360_v38 }
 0x303   : > { %3082 = vmatpush3.msra.mxu1 %v1360_v38  ;;  %v1227_v20 = vrot.slane %v1219_v53, %v3987_v21  ;;  %v1234_v43 = vrot.slane %v1220_v52, %v3987_v21  ;;  %v1242_v22 = vrot.slane %v1235_v60, %v3987_v21  ;;  %v4044_v21 = vld [vmem:[%s4361_s5 + $0x10] sm:$0xff] }
 0x305   : > { %v1243_v35 = vcombine.low %v1203_v36, %v1227_v20  ;;  %v1244_v63 = vcombine.high %v1203_v36, %v1227_v20  ;;  %v4028_v48 = vcombine.low %v3992_v45, %v1234_v43  ;;  %v4031_v1 = vcombine.high %v3992_v45, %v1234_v43  ;;  %v4055_v45 = vld [vmem:[%s4361_s5 + $0x18] sm:$0xff] }
 0x306   : > { %v4039_v37 = vcombine.low %v3995_v34, %v1242_v22  ;;  %v1361_v34 = vcombine.high %v1320_v49, %v1344_v50 }
 0x307   : > { %3083 = vmatprep.subr.mxu1 %v1243_v35 }
 0x308   : > { %3084 = vmatpush3.msra.mxu1 %v1243_v35 }
 0x309   : > { %3086 = vmatmul.mubr.msk.f32.vlgmr.msra.gmra.mxu1 %vm1373_vm2, %v4036_v33  ;;  %3097 = vmatprep.subr.mxu1 %v3965_v19 }
 0x30a   : > { %3098 = vmatpush3.msra.mxu1 %v3965_v19  ;;  %3088 = vmatprep.mubr.msk.f32.mxu1 %vm1373_vm2, %v4044_v21 }
 0x30b   : > { %3099 = vmatprep.subr.mxu1 %v3971_v25 }
 0x30c   : > { %3100 = vmatpush3.msra.mxu1 %v3971_v25 }
 0x30d   : > { %3089 = vmatmul.mubr.msk.f32.gmra.mxu1 %vm1373_vm2, %v4055_v45  ;;  %3113 = vmatprep.subr.mxu1 %v1361_v34 }
 0x30e   : > { %3091 = vmatprep.mubr.msk.f32.mxu1 %vm1373_vm2, %v4061_v3 }
 0x311   : > { %3092 = vmatmul.mubr.msk.f32.gmra.mxu1 %vm1373_vm2, %v4071_v15 }
 0x312   : > { %3094 = vmatprep.mubr.msk.f32.mxu1 %vm1373_vm2, %v4076_v4 }
 0x315   : > { %3095 = vmatmul.mubr.msk.f32.gmra.mxu1 %vm1373_vm2, %v4085_v10 }
 0x3c9   : > { %v3087_v32 = vpop.f32.mrf.mxu1 }
 0x3cb   : > { %v1464_v7 = vpop.f32.mrf.mxu1 }
 0x3cc   : > { %3101 = vmatprep.mubr.msk.f32.mxu1 %vm1373_vm2, %v1464_v7 }
 0x3cd   : > { %v3090_v5 = vpop.f32.mrf.mxu1  ;;  %3102 = vmatmul.mubr.msk.f32.vlgmr.msra.gmra.mxu1 %vm1373_vm2, %v3087_v32 }
 0x3ce   : > { %3114 = vmatpush3.msra.mxu1 %v1361_v34 }
 0x3cf   : > { %3115 = vmatprep.subr.mxu1 %v1244_v63  ;;  %v1474_v31 = vpop.f32.mrf.mxu1 }
 0x3d0   : > { %3116 = vmatpush3.msra.mxu1 %v1244_v63  ;;  %3104 = vmatprep.mubr.msk.f32.mxu1 %vm1373_vm2, %v1474_v31 }
 0x3d1   : > { %v3093_v2 = vpop.f32.mrf.mxu1  ;;  %3105 = vmatmul.mubr.msk.f32.gmra.mxu1 %vm1373_vm2, %v3090_v5  ;;  %3129 = vmatprep.subr.mxu1 %v3965_v19 }
 0x3d3   : > { %v1484_v8 = vpop.f32.mrf.mxu1 }
 0x3d4   : > { %3107 = vmatprep.mubr.msk.f32.mxu1 %vm1373_vm2, %v1484_v8 }
 0x3d5   : > { %v3096_v61 = vpop.f32.mrf.mxu1  ;;  %3108 = vmatmul.mubr.msk.f32.gmra.mxu1 %vm1373_vm2, %v3093_v2 }
 0x3d7   : > { %v1494_v30 = vpop.f32.mrf.mxu1 }
 0x3d8   : > { %3110 = vmatprep.mubr.msk.f32.mxu1 %vm1373_vm2, %v1494_v30 }
 0x3d9   : > { %3111 = vmatmul.mubr.msk.f32.gmra.mxu1 %vm1373_vm2, %v3096_v61 }
 0x3da   : > { %3117 = vmatprep.mubr.msk.f32.mxu1 %vm1373_vm2, %v3958_v26 }
 0x3dd   : > { %3118 = vmatmul.mubr.msk.f32.vlgmr.msra.gmra.mxu1 %vm1373_vm2, %v4036_v33 }
 0x3de   : > { %3130 = vmatpush3.msra.mxu1 %v3965_v19  ;;  %3120 = vmatprep.mubr.msk.f32.mxu1 %vm1373_vm2, %v4044_v21 }
 0x3df   : > { %3131 = vmatprep.subr.mxu1 %v3971_v25 }
 0x3e0   : > { %3132 = vmatpush3.msra.mxu1 %v3971_v25 }
 0x3e1   : > { %3145 = vmatprep.subr.mxu1 %v4017_v42  ;;  %3121 = vmatmul.mubr.msk.f32.gmra.mxu1 %vm1373_vm2, %v4055_v45 }
 0x3e2   : > { %3123 = vmatprep.mubr.msk.f32.mxu1 %vm1373_vm2, %v4061_v3 }
 0x3e5   : > { %3124 = vmatmul.mubr.msk.f32.gmra.mxu1 %vm1373_vm2, %v4071_v15 }
 0x3e6   : > { %3126 = vmatprep.mubr.msk.f32.mxu1 %vm1373_vm2, %v4076_v4 }
 0x3e9   : > { %3127 = vmatmul.mubr.msk.f32.gmra.mxu1 %vm1373_vm2, %v4085_v10 }
 0x48d   : > { %v3103_v9 = vpop.f32.mrf.mxu1 }
 0x48e   : > { %1636 = vst.msk [vmem:[%s4121_s23 + $0x8] sm:$0xff] %vm1634_vm3, %v3103_v9 }
 0x48f   : > { %v1595_v58 = vpop.f32.mrf.mxu1 }
 0x490   : > { %1635 = vst.msk [vmem:[%s4121_s23] sm:$0xff] %vm1634_vm3, %v1595_v58 }
 0x491   : > { %v3106_v12 = vpop.f32.mrf.mxu1 }
 0x492   : > { %1638 = vst.msk [vmem:[%s4121_s23 + $0x18] sm:$0xff] %vm1634_vm3, %v3106_v12 }
 0x493   : > { %v1605_v54 = vpop.f32.mrf.mxu1 }
 0x494   : > { %1637 = vst.msk [vmem:[%s4121_s23 + $0x10] sm:$0xff] %vm1634_vm3, %v1605_v54 }
 0x495   : > { %v3109_v29 = vpop.f32.mrf.mxu1 }
 0x496   : > { %1640 = vst.msk [vmem:[%s4121_s23 + $0x28] sm:$0xff] %vm1634_vm3, %v3109_v29 }
 0x497   : > { %v1615_v51 = vpop.f32.mrf.mxu1 }
 0x498   : > { %1639 = vst.msk [vmem:[%s4121_s23 + $0x20] sm:$0xff] %vm1634_vm3, %v1615_v51 }
 0x499   : > { %v3112_v13 = vpop.f32.mrf.mxu1 }
 0x49a   : > { %1642 = vst.msk [vmem:[%s4121_s23 + $0x38] sm:$0xff] %vm1634_vm3, %v3112_v13 }
 0x49b   : > { %v1625_v47 = vpop.f32.mrf.mxu1 }
 0x49c   : > { %1641 = vst.msk [vmem:[%s4121_s23 + $0x30] sm:$0xff] %vm1634_vm3, %v1625_v47 }
 0x49d   : > { %v3119_v28 = vpop.f32.mrf.mxu1 }
 0x49f   : > { %v1741_v14 = vpop.f32.mrf.mxu1 }
 0x4a0   : > { %3133 = vmatprep.mubr.msk.f32.mxu1 %vm1373_vm2, %v1741_v14 }
 0x4a1   : > { %v3122_v17 = vpop.f32.mrf.mxu1  ;;  %3134 = vmatmul.mubr.msk.f32.vlgmr.msra.gmra.mxu1 %vm1373_vm2, %v3119_v28 }
 0x4a2   : > { %3146 = vmatpush3.msra.mxu1 %v4017_v42 }
 0x4a3   : > { %3147 = vmatprep.subr.mxu1 %v4028_v48  ;;  %v1751_v11 = vpop.f32.mrf.mxu1 }
 0x4a4   : > { %3148 = vmatpush3.msra.mxu1 %v4028_v48  ;;  %3136 = vmatprep.mubr.msk.f32.mxu1 %vm1373_vm2, %v1751_v11 }
 0x4a5   : > { %v3125_v6 = vpop.f32.mrf.mxu1  ;;  %3137 = vmatmul.mubr.msk.f32.gmra.mxu1 %vm1373_vm2, %v3122_v17  ;;  %3161 = vmatprep.subr.mxu1 %v3965_v19 }
 0x4a7   : > { %v1761_v27 = vpop.f32.mrf.mxu1 }
 0x4a8   : > { %3139 = vmatprep.mubr.msk.f32.mxu1 %vm1373_vm2, %v1761_v27 }
 0x4a9   : > { %v3128_v0 = vpop.f32.mrf.mxu1  ;;  %3140 = vmatmul.mubr.msk.f32.gmra.mxu1 %vm1373_vm2, %v3125_v6 }
 0x4ab   : > { %v1771_v16 = vpop.f32.mrf.mxu1 }
 0x4ac   : > { %3142 = vmatprep.mubr.msk.f32.mxu1 %vm1373_vm2, %v1771_v16 }
 0x4ad   : > { %3143 = vmatmul.mubr.msk.f32.gmra.mxu1 %vm1373_vm2, %v3128_v0 }
 0x4ae   : > { %3149 = vmatprep.mubr.msk.f32.mxu1 %vm1373_vm2, %v3958_v26 }
 0x4b1   : > { %3150 = vmatmul.mubr.msk.f32.vlgmr.msra.gmra.mxu1 %vm1373_vm2, %v4036_v33 }
 0x4b2   : > { %3162 = vmatpush3.msra.mxu1 %v3965_v19  ;;  %3152 = vmatprep.mubr.msk.f32.mxu1 %vm1373_vm2, %v4044_v21 }
 0x4b3   : > { %3163 = vmatprep.subr.mxu1 %v3971_v25 }
 0x4b4   : > { %3164 = vmatpush3.msra.mxu1 %v3971_v25 }
 0x4b5   : > { %3177 = vmatprep.subr.mxu1 %v4019_v59  ;;  %3153 = vmatmul.mubr.msk.f32.gmra.mxu1 %vm1373_vm2, %v4055_v45 }
 0x4b6   : > { %3155 = vmatprep.mubr.msk.f32.mxu1 %vm1373_vm2, %v4061_v3 }
 0x4b9   : > { %3156 = vmatmul.mubr.msk.f32.gmra.mxu1 %vm1373_vm2, %v4071_v15 }
 0x4ba   : > { %3158 = vmatprep.mubr.msk.f32.mxu1 %vm1373_vm2, %v4076_v4 }
 0x4bd   : > { %3159 = vmatmul.mubr.msk.f32.gmra.mxu1 %vm1373_vm2, %v4085_v10 }
 0x561   : > { %v3135_v18 = vpop.f32.mrf.mxu1 }
 0x562   : > { %2899 = vst.msk [vmem:[%s4121_s23 + $0x48] sm:$0xff] %vm1634_vm3, %v3135_v18 }
 0x563   : > { %v1872_v44 = vpop.f32.mrf.mxu1 }
 0x564   : > { %2898 = vst.msk [vmem:[%s4121_s23 + $0x40] sm:$0xff] %vm1634_vm3, %v1872_v44 }
 0x565   : > { %v3138_v24 = vpop.f32.mrf.mxu1 }
 0x566   : > { %2901 = vst.msk [vmem:[%s4121_s23 + $0x58] sm:$0xff] %vm1634_vm3, %v3138_v24 }
 0x567   : > { %v1882_v46 = vpop.f32.mrf.mxu1 }
 0x568   : > { %2900 = vst.msk [vmem:[%s4121_s23 + $0x50] sm:$0xff] %vm1634_vm3, %v1882_v46 }
 0x569   : > { %v3141_v49 = vpop.f32.mrf.mxu1 }
 0x56a   : > { %2903 = vst.msk [vmem:[%s4121_s23 + $0x68] sm:$0xff] %vm1634_vm3, %v3141_v49 }
 0x56b   : > { %v1892_v23 = vpop.f32.mrf.mxu1 }
 0x56c   : > { %2902 = vst.msk [vmem:[%s4121_s23 + $0x60] sm:$0xff] %vm1634_vm3, %v1892_v23 }
 0x56d   : > { %v3144_v50 = vpop.f32.mrf.mxu1 }
 0x56e   : > { %2905 = vst.msk [vmem:[%s4121_s23 + $0x78] sm:$0xff] %vm1634_vm3, %v3144_v50 }
 0x56f   : > { %v1902_v55 = vpop.f32.mrf.mxu1 }
 0x570   : > { %2904 = vst.msk [vmem:[%s4121_s23 + $0x70] sm:$0xff] %vm1634_vm3, %v1902_v55 }
 0x571   : > { %v3151_v56 = vpop.f32.mrf.mxu1 }
 0x573   : > { %v2018_v39 = vpop.f32.mrf.mxu1 }
 0x574   : > { %3165 = vmatprep.mubr.msk.f32.mxu1 %vm1373_vm2, %v2018_v39 }
 0x575   : > { %v3154_v40 = vpop.f32.mrf.mxu1  ;;  %3166 = vmatmul.mubr.msk.f32.vlgmr.msra.gmra.mxu1 %vm1373_vm2, %v3151_v56 }
 0x576   : > { %3178 = vmatpush3.msra.mxu1 %v4019_v59 }
 0x577   : > { %3179 = vmatprep.subr.mxu1 %v4031_v1  ;;  %v2028_v57 = vpop.f32.mrf.mxu1 }
 0x578   : > { %3180 = vmatpush3.msra.mxu1 %v4031_v1  ;;  %3168 = vmatprep.mubr.msk.f32.mxu1 %vm1373_vm2, %v2028_v57 }
 0x579   : > { %v3157_v41 = vpop.f32.mrf.mxu1  ;;  %3169 = vmatmul.mubr.msk.f32.gmra.mxu1 %vm1373_vm2, %v3154_v40  ;;  %3241 = vmatprep.subr.mxu1 %v3965_v19 }
 0x57b   : > { %v2038_v38 = vpop.f32.mrf.mxu1 }
 0x57c   : > { %3171 = vmatprep.mubr.msk.f32.mxu1 %vm1373_vm2, %v2038_v38 }
 0x57d   : > { %v3160_v42 = vpop.f32.mrf.mxu1  ;;  %3172 = vmatmul.mubr.msk.f32.gmra.mxu1 %vm1373_vm2, %v3157_v41 }
 0x57f   : > { %v2048_v53 = vpop.f32.mrf.mxu1 }
 0x580   : > { %3174 = vmatprep.mubr.msk.f32.mxu1 %vm1373_vm2, %v2048_v53 }
 0x581   : > { %3175 = vmatmul.mubr.msk.f32.gmra.mxu1 %vm1373_vm2, %v3160_v42 }
 0x582   : > { %3181 = vmatprep.mubr.msk.f32.mxu1 %vm1373_vm2, %v3958_v26 }
 0x585   : > { %3182 = vmatmul.mubr.msk.f32.vlgmr.msra.gmra.mxu1 %vm1373_vm2, %v4036_v33 }
 0x586   : > { %3243 = vmatpush3.msra.mxu1 %v3965_v19  ;;  %3184 = vmatprep.mubr.msk.f32.mxu1 %vm1373_vm2, %v4044_v21 }
 0x587   : > { %3242 = vmatprep.subr.mxu1 %v3971_v25 }
 0x588   : > { %3244 = vmatpush3.msra.mxu1 %v3971_v25 }
 0x589   : > { %3209 = vmatprep.subr.mxu1 %v4021_v62  ;;  %3185 = vmatmul.mubr.msk.f32.gmra.mxu1 %vm1373_vm2, %v4055_v45 }
 0x58a   : > { %3187 = vmatprep.mubr.msk.f32.mxu1 %vm1373_vm2, %v4061_v3 }
 0x58d   : > { %3188 = vmatmul.mubr.msk.f32.gmra.mxu1 %vm1373_vm2, %v4071_v15 }
 0x58e   : > { %3190 = vmatprep.mubr.msk.f32.mxu1 %vm1373_vm2, %v4076_v4 }
 0x591   : > { %3191 = vmatmul.mubr.msk.f32.gmra.mxu1 %vm1373_vm2, %v4085_v10 }
 0x635   : > { %v3167_v59 = vpop.f32.mrf.mxu1 }
 0x636   : > { %2923 = vst.msk [vmem:[%s4121_s23 + $0x88] sm:$0xff] %vm1634_vm3, %v3167_v59 }
 0x637   : > { %v2149_v52 = vpop.f32.mrf.mxu1 }
 0x638   : > { %2922 = vst.msk [vmem:[%s4121_s23 + $0x80] sm:$0xff] %vm1634_vm3, %v2149_v52 }
 0x639   : > { %v3170_v60 = vpop.f32.mrf.mxu1 }
 0x63a   : > { %2925 = vst.msk [vmem:[%s4121_s23 + $0x98] sm:$0xff] %vm1634_vm3, %v3170_v60 }
 0x63b   : > { %v2159_v36 = vpop.f32.mrf.mxu1 }
 0x63c   : > { %2924 = vst.msk [vmem:[%s4121_s23 + $0x90] sm:$0xff] %vm1634_vm3, %v2159_v36 }
 0x63d   : > { %v3173_v20 = vpop.f32.mrf.mxu1 }
 0x63e   : > { %2927 = vst.msk [vmem:[%s4121_s23 + $0xa8] sm:$0xff] %vm1634_vm3, %v3173_v20 }
 0x63f   : > { %v2169_v43 = vpop.f32.mrf.mxu1 }
 0x640   : > { %2926 = vst.msk [vmem:[%s4121_s23 + $0xa0] sm:$0xff] %vm1634_vm3, %v2169_v43 }
 0x641   : > { %v3176_v22 = vpop.f32.mrf.mxu1 }
 0x642   : > { %2929 = vst.msk [vmem:[%s4121_s23 + $0xb8] sm:$0xff] %vm1634_vm3, %v3176_v22 }
 0x643   : > { %v2179_v35 = vpop.f32.mrf.mxu1 }
 0x644   : > { %2928 = vst.msk [vmem:[%s4121_s23 + $0xb0] sm:$0xff] %vm1634_vm3, %v2179_v35 }
 0x645   : > { %v3183_v63 = vpop.f32.mrf.mxu1 }
 0x647   : > { %v2295_v48 = vpop.f32.mrf.mxu1 }
 0x648   : > { %3197 = vmatprep.mubr.msk.f32.mxu0 %vm1373_vm2, %v2295_v48 }
 0x649   : > { %v3186_v1 = vpop.f32.mrf.mxu1  ;;  %3198 = vmatmul.mubr.msk.f32.vlgmr.msra.gmra.mxu0 %vm1373_vm2, %v3183_v63 }
 0x64a   : > { %3226 = vmatpush3.msra.mxu0 %v3965_v19 }
 0x64b   : > { %v2305_v34 = vpop.f32.mrf.mxu1  ;;  %3227 = vmatprep.subr.mxu0 %v3971_v25 }
 0x64c   : > { %3200 = vmatprep.mubr.msk.f32.mxu0 %vm1373_vm2, %v2305_v34  ;;  %3228 = vmatpush3.msra.mxu0 %v3971_v25 }
 0x64d   : > { %v3189_v32 = vpop.f32.mrf.mxu1  ;;  %3201 = vmatmul.mubr.msk.f32.gmra.mxu0 %vm1373_vm2, %v3186_v1 }
 0x64f   : > { %v2315_v7 = vpop.f32.mrf.mxu1 }
 0x650   : > { %3203 = vmatprep.mubr.msk.f32.mxu0 %vm1373_vm2, %v2315_v7 }
 0x651   : > { %v3192_v5 = vpop.f32.mrf.mxu1  ;;  %3204 = vmatmul.mubr.msk.f32.gmra.mxu0 %vm1373_vm2, %v3189_v32 }
 0x653   : > { %v2325_v31 = vpop.f32.mrf.mxu1 }
 0x654   : > { %3206 = vmatprep.mubr.msk.f32.mxu1 %vm1373_vm2, %v2325_v31 }
 0x655   : > { %3207 = vmatmul.mubr.msk.f32.vlgmr.msra.gmra.mxu1 %vm1373_vm2, %v3192_v5 }
 0x656   : > { %3210 = vmatpush3.msra.mxu1 %v4021_v62  ;;  %3213 = vmatprep.mubr.msk.f32.mxu1 %vm1373_vm2, %v3958_v26 }
 0x657   : > { %3211 = vmatprep.subr.mxu1 %v4039_v37 }
 0x658   : > { %3212 = vmatpush3.msra.mxu1 %v4039_v37 }
 0x659   : > { %3214 = vmatmul.mubr.msk.f32.vlgmr.msra.gmra.mxu1 %vm1373_vm2, %v4036_v33 }
 0x65a   : > { %3216 = vmatprep.mubr.msk.f32.mxu1 %vm1373_vm2, %v4044_v21 }
 0x65d   : > { %3217 = vmatmul.mubr.msk.f32.gmra.mxu1 %vm1373_vm2, %v4055_v45 }
 0x65e   : > { %3219 = vmatprep.mubr.msk.f32.mxu1 %vm1373_vm2, %v4061_v3 }
 0x661   : > { %3220 = vmatmul.mubr.msk.f32.gmra.mxu1 %vm1373_vm2, %v4071_v15 }
 0x662   : > { %3222 = vmatprep.mubr.msk.f32.mxu1 %vm1373_vm2, %v4076_v4 }
 0x665   : > { %3223 = vmatmul.mubr.msk.f32.gmra.mxu1 %vm1373_vm2, %v4085_v10 }
 0x709   : > { %v3199_v26 = vpop.f32.mrf.mxu0 }
 0x70a   : > { %2947 = vst.msk [vmem:[%s4121_s23 + $0xc8] sm:$0xff] %vm1634_vm3, %v3199_v26 }
 0x70b   : > { %v2426_v19 = vpop.f32.mrf.mxu0 }
 0x70c   : > { %2946 = vst.msk [vmem:[%s4121_s23 + $0xc0] sm:$0xff] %vm1634_vm3, %v2426_v19 }
 0x70d   : > { %v3202_v25 = vpop.f32.mrf.mxu0 }
 0x70e   : > { %2949 = vst.msk [vmem:[%s4121_s23 + $0xd8] sm:$0xff] %vm1634_vm3, %v3202_v25 }
 0x70f   : > { %v2436_v62 = vpop.f32.mrf.mxu0 }
 0x710   : > { %2948 = vst.msk [vmem:[%s4121_s23 + $0xd0] sm:$0xff] %vm1634_vm3, %v2436_v62 }
 0x711   : > { %v3205_v33 = vpop.f32.mrf.mxu0 }
 0x712   : > { %2951 = vst.msk [vmem:[%s4121_s23 + $0xe8] sm:$0xff] %vm1634_vm3, %v3205_v33 }
 0x713   : > { %v2446_v37 = vpop.f32.mrf.mxu0 }
 0x714   : > { %2950 = vst.msk [vmem:[%s4121_s23 + $0xe0] sm:$0xff] %vm1634_vm3, %v2446_v37 }
 0x715   : > { %v3208_v21 = vpop.f32.mrf.mxu1 }
 0x716   : > { %2953 = vst.msk [vmem:[%s4121_s23 + $0xf8] sm:$0xff] %vm1634_vm3, %v3208_v21 }
 0x717   : > { %v2456_v45 = vpop.f32.mrf.mxu1 }
 0x718   : > { %2952 = vst.msk [vmem:[%s4121_s23 + $0xf0] sm:$0xff] %vm1634_vm3, %v2456_v45 }
 0x719   : > { %v3215_v3 = vpop.f32.mrf.mxu1 }
 0x71b   : > { %v2572_v15 = vpop.f32.mrf.mxu1 }
 0x71c   : > { %3229 = vmatprep.mubr.msk.f32.mxu0 %vm1373_vm2, %v2572_v15 }
 0x71d   : > { %v3218_v4 = vpop.f32.mrf.mxu1  ;;  %3230 = vmatmul.mubr.msk.f32.vlgmr.msra.gmra.mxu0 %vm1373_vm2, %v3215_v3 }
 0x71f   : > { %v2582_v10 = vpop.f32.mrf.mxu1 }
 0x720   : > { %3232 = vmatprep.mubr.msk.f32.mxu0 %vm1373_vm2, %v2582_v10 }
 0x721   : > { %v3221_v2 = vpop.f32.mrf.mxu1  ;;  %3233 = vmatmul.mubr.msk.f32.gmra.mxu0 %vm1373_vm2, %v3218_v4 }
 0x723   : > { %v2592_v8 = vpop.f32.mrf.mxu1 }
 0x724   : > { %3235 = vmatprep.mubr.msk.f32.mxu0 %vm1373_vm2, %v2592_v8 }
 0x725   : > { %v3224_v61 = vpop.f32.mrf.mxu1  ;;  %3236 = vmatmul.mubr.msk.f32.gmra.mxu0 %vm1373_vm2, %v3221_v2 }
 0x727   : > { %v2602_v30 = vpop.f32.mrf.mxu1 }
 0x728   : > { %3238 = vmatprep.mubr.msk.f32.mxu0 %vm1373_vm2, %v2602_v30 }
 0x729   : > { %3239 = vmatmul.mubr.msk.f32.gmra.mxu0 %vm1373_vm2, %v3224_v61 }
 0x7dd   : > { %v3231_v9 = vpop.f32.mrf.mxu0 }
 0x7de   : > { %2971 = vst.msk [vmem:[%s4121_s23 + $0x108] sm:$0xff] %vm1634_vm3, %v3231_v9 }
 0x7df   : > { %v2703_v58 = vpop.f32.mrf.mxu0 }
 0x7e0   : > { %2970 = vst.msk [vmem:[%s4121_s23 + $0x100] sm:$0xff] %vm1634_vm3, %v2703_v58 }
 0x7e1   : > { %v3234_v12 = vpop.f32.mrf.mxu0 }
 0x7e2   : > { %2973 = vst.msk [vmem:[%s4121_s23 + $0x118] sm:$0xff] %vm1634_vm3, %v3234_v12 }
 0x7e3   : > { %v2713_v54 = vpop.f32.mrf.mxu0 }
 0x7e4   : > { %2972 = vst.msk [vmem:[%s4121_s23 + $0x110] sm:$0xff] %vm1634_vm3, %v2713_v54 }
 0x7e5   : > { %v3237_v29 = vpop.f32.mrf.mxu0 }
 0x7e6   : > { %2975 = vst.msk [vmem:[%s4121_s23 + $0x128] sm:$0xff] %vm1634_vm3, %v3237_v29 }
 0x7e7   : > { %v2723_v51 = vpop.f32.mrf.mxu0 }
 0x7e8   : > { %2974 = vst.msk [vmem:[%s4121_s23 + $0x120] sm:$0xff] %vm1634_vm3, %v2723_v51 }
 0x7e9   : > { %v3240_v13 = vpop.f32.mrf.mxu0 }
 0x7ea   : > { %2977 = vst.msk [vmem:[%s4121_s23 + $0x138] sm:$0xff] %vm1634_vm3, %v3240_v13 }
 0x7eb   : > { %v2733_v47 = vpop.f32.mrf.mxu0 }
 0x7ec   : > { %2976 = vst.msk [vmem:[%s4121_s23 + $0x130] sm:$0xff] %vm1634_vm3, %v2733_v47 }
 0x7ed   : > { %3314 = shalt.err (!%p3311_p3)
}
 0x7ee   : > { %s3315_s20 = scalar_lea.hbm %s4306_s14, 5120  ;;  %s3319_s22 = scalar_lea.hbm %s4363_s7, 10240 }
 0x7ef   : > { %p3316_p4 = scmp.ne.s32.totalorder %s4306_s14, %s3315_s20  ;;  %p3320_p9 = scmp.lt.s32.totalorder %s4306_s14, %s4363_s7 }
 0x7f0   : > { %p3321_p10 = scmp.lt.s32.totalorder %s3319_s22, %s3315_s20 }
 0x7f1   : > { %p3317_p7 = pnand %p3316_p4, %p3454_p5 }
 0x7f2   : > { %p3322_p11 = por %p3321_p10, %p3320_p9 }
 0x7f3   : > { %p3318_p8 = pneg %p3317_p7 }
 0x7f5   : > { %p3323_p12 = pnand %p3322_p11, %p3318_p8 }
 0x7f7   : > { %3326 = shalt.err (!%p3323_p12)
}
 0x7f8   : > { %s3374_s9 = smov 128   ;;  %s3375_s13 = smov 8  }
 0x7f9   : > { %3248 = dma.vmem_to_hbm [thread:$0]  (%p3454_p5), %s4308_s8, 5120, %s4306_s14, %s4316_s28, %s3374_s9, %s3374_s9, %s3375_s13  }
 0x7fa PF: > { %p3254_p13 = scmp.ge.s32.totalorder %s3361_s27, 2  ;;  %s2780_s15 = sand.u32 1, %s3349_s24  }
 0x7fb   : > { %s2781_s16 = scalar_lea.sflag [#allocation3], %s2780_s15 }
 0x7fc   : > { %p3251_p0 = pnand %p3254_p13, %p3458_p6 }
 0x7fe   : > { %p3252_p1 = pneg %p3251_p0 }
 0x800   : > { %3344 = dma.done.wait (%p3252_p1), %s2781_s16, 5120  }
 0x801   : > { %3346 = vsyncadd (%p3252_p1), %s2781_s16, 4294962176  ;;  %p17_p2 = scmp.ge.s32.totalorder %s3441_s30, 4   ;;  %s4366_s24 = smov %s3353_s25 }
 0x802   : > { %s4367_s25 = smov %s3357_s26  ;;  %s4368_s26 = smov %s3452_s10 }
 0x803   : > { %s4369_s27 = smov %s3441_s30  ;;  %19 = sbr.rel (!%p17_p2) target bundleno = 3 (0x3), region = 87 }
 0x808   :  { %2786 = vsyncpa [#allocation3], 1 }
 0x809   :  { %2788 = vsyncpa [#allocation3 + $0x1], 1 }

</bundles_post_ra>
